<compile_context>
chip_gen: v7x
topology: tpu7x:2x2x1
jax: 0.10.0
libtpu: 0.0.40
codegen_flags: <defaults>
</compile_context>

<pallas_src>
import math

import jax
import jax.numpy as jnp
from jax.experimental import pallas as pl
from jax.experimental.pallas import tpu as pltpu


def coupled_attention_kernel(h_ref, w_ref, mask_ref,
                             wi_ref, wh_ref, r0_ref, v_ref,
                             r_out_ref, rv_out_ref):
    B, L, _nh = h_ref.shape
    H2 = w_ref.shape[-1]          # 2K
    H6 = wi_ref.shape[-1]         # 6K

    mask = mask_ref[...]          # (B, L, 1)

    # ---- beta: ONE batched MXU matmul + tanh, masked pre-GRU -----------------------
    beta = jnp.tanh(
        jnp.einsum('bli,bik->blk', h_ref[...], w_ref[...],
                   preferred_element_type=jnp.float32)) * mask            # (B, L, 2K)

    # ---- GRU input projection for all (b, t) at once: [x_r | x_z | x_n] ------------
    x_all = jnp.dot(beta.reshape(B * L, H2), wi_ref[...],
                    preferred_element_type=jnp.float32).reshape(B, L, H6)  # (B, L, 6K)

    wh = wh_ref[...]              # (2K, 6K) = [W_hr | W_hz | W_hn] in x @ W form
    hprev = r0_ref[...]           # (B, 2K)

    # ---- recurrence batched over B: L sequential steps (gate order r, z, n) --------
    for t in range(L):            # L is small & static -> unrolled
        x_t = x_all[:, t, :]                                               # (B, 6K)
        g = jnp.dot(hprev, wh, preferred_element_type=jnp.float32)         # (B, 6K)
        r_g = jax.nn.sigmoid(x_t[:, 0:H2] + g[:, 0:H2])
        z_g = jax.nn.sigmoid(x_t[:, H2:2 * H2] + g[:, H2:2 * H2])
        n_g = jnp.tanh(x_t[:, 2 * H2:] + r_g * g[:, 2 * H2:])
        hprev = (1.0 - z_g) * n_g + z_g * hprev
        # post-GRU mask applied on store, written directly per timestep
        r_out_ref[:, t, :] = (hprev * mask[:, t, :]).astype(r_out_ref.dtype)

    # ---- rv = r @ v as VPU multiply + lane reduction into lane-dense (B, L) --------
    r_full = r_out_ref[...]                                                # (B, L, 2K)
    rv_out_ref[...] = jnp.sum(r_full * v_ref[...],
                              axis=-1).astype(rv_out_ref.dtype)            # (B, L)


def coupled_attention_forward(params, h, u_a, u_o, mask):
    """Layout glue (transposes / gate-weight concat / G@u fusion) + one pallas_call."""
    B, L, nh = h.shape
    K = params["G_a"].shape[0]
    H2 = 2 * K
    hp = jax.lax.Precision.HIGHEST

    ga = params["G_a"][:, 0].astype(jnp.float32)                 # (K, nh, nh)
    go = params["G_o"][:, 0].astype(jnp.float32)

    # Fused bilinear weights: W[b, i, c] = sum_j Gcat[c, i, j] * u_c[j, b] -> (B, nh, 2K)
    wa = jnp.einsum('kij,jb->bik', ga, u_a.astype(jnp.float32), precision=hp)  # (B, nh, K)
    wo = jnp.einsum('kij,jb->bik', go, u_o.astype(jnp.float32), precision=hp)
    w_beta = jnp.concatenate([wa, wo], axis=-1)                  # (B, nh, 2K)

    # PyTorch GRU stacks [W_r; W_z; W_n] along dim 0; transpose to x @ W form and keep
    # the three gates concatenated along the output dim -> (2K, 6K).
    wi = params["w_ih"].astype(jnp.float32).T                    # (2K, 6K) = [r | z | n]
    wh = params["w_hh"].astype(jnp.float32).T                    # (2K, 6K)

    mask_f = mask.astype(jnp.float32)[:, :, None]                # (B, L, 1)
    r0 = jnp.broadcast_to(params["r0"].astype(jnp.float32)[None, :], (B, H2))  # (B, 2K)
    v = params["v"].astype(jnp.float32).reshape(1, 1, H2)        # broadcast over (B, L, 2K)

    vmem = pl.BlockSpec(memory_space=pltpu.MemorySpace.VMEM)
    # Whole problem is VMEM-resident (<100 KB) and the recurrence is batched over B inside
    # a single kernel invocation -> no grid.
    # TODO(synk): at production B/L, add grid=(B,) with dimension_semantics=("parallel",)
    #             to use v7x's second TensorCore, and tile h over L ("arbitrary") carrying
    #             the GRU state in a VMEM scratch.
    r, rv = pl.pallas_call(
        coupled_attention_kernel,
        out_shape=(jax.ShapeDtypeStruct((B, L, H2), jnp.float32),
                   jax.ShapeDtypeStruct((B, L), jnp.float32)),
        in_specs=[vmem] * 7,
        out_specs=(vmem, vmem),
    )(h.astype(jnp.float32), w_beta, mask_f, wi, wh, r0, v)
    return r, rv


def reference_forward(params, h, u_a, u_o, mask):
    """Pure-JAX reference mirroring the PyTorch forward (eval mode)."""
    hp = jax.lax.Precision.HIGHEST
    Ga = params["G_a"][:, 0]
    Go = params["G_o"][:, 0]
    f = lambda G, u: jnp.einsum('bli,kij,jb->kbl', h, G, u, precision=hp)
    beta = jnp.tanh(jnp.concatenate([f(Ga, u_a), f(Go, u_o)], axis=0))   # (2K, B, L)
    beta = jnp.transpose(beta, (1, 2, 0)) * mask[..., None].astype(jnp.float32)

    w_ih, w_hh = params["w_ih"], params["w_hh"]
    H2 = w_hh.shape[1]

    def cell(h_prev, x_t):
        gi = jnp.dot(x_t, w_ih.T, precision=hp)
        gh = jnp.dot(h_prev, w_hh.T, precision=hp)
        r = jax.nn.sigmoid(gi[:, :H2] + gh[:, :H2])
        z = jax.nn.sigmoid(gi[:, H2:2 * H2] + gh[:, H2:2 * H2])
        n = jnp.tanh(gi[:, 2 * H2:] + r * gh[:, 2 * H2:])
        h_new = (1.0 - z) * n + z * h_prev
        return h_new, h_new

    h0 = jnp.broadcast_to(params["r0"][None, :], (h.shape[0], H2))
    _, r_seq = jax.lax.scan(cell, h0, jnp.transpose(beta, (1, 0, 2)))
    r = jnp.transpose(r_seq, (1, 0, 2)) * mask[..., None].astype(jnp.float32)
    return r, jnp.dot(r, params["v"], precision=hp)


if __name__ == "__main__":
    nh, K = 8, 4          # module hyper-params
    B, L = 2, 8           # batch, sequence length
    H2 = 2 * K

    key = jax.random.PRNGKey(0)
    ks = jax.random.split(key, 10)
    uni = lambda k, shape, lo, hi: jax.random.uniform(k, shape, jnp.float32, lo, hi)
    bound = 1.0 / math.sqrt(H2)   # PyTorch GRU default init range

    params = {
        "r0":   uni(ks[0], (H2,), -0.2, 0.2),
        "v":    uni(ks[1], (H2,), -0.2, 0.2),
        "G_a":  uni(ks[2], (K, 1, nh, nh), -0.2, 0.2),
        "G_o":  uni(ks[3], (K, 1, nh, nh), -0.2, 0.2),
        "w_ih": uni(ks[4], (3 * H2, H2), -bound, bound),
        "w_hh": uni(ks[5], (3 * H2, H2), -bound, bound),
    }

    h = jax.random.normal(ks[6], (B, L, nh), jnp.float32)
    u_a = jax.random.normal(ks[7], (nh, B), jnp.float32)
    u_o = jax.random.normal(ks[8], (nh, B), jnp.float32)
    mask = (jax.random.uniform(ks[9], (B, L)) > 0.3).astype(jnp.float32)

    r, rv = coupled_attention_forward(params, h, u_a, u_o, mask)
    jax.block_until_ready((r, rv))

    r_ref, rv_ref = reference_forward(params, h, u_a, u_o, mask)
    assert r.shape == (B, L, H2) and rv.shape == (B, L)
    assert jnp.allclose(r, r_ref, atol=2e-3, rtol=2e-3), "r mismatch vs reference"
    assert jnp.allclose(rv, rv_ref, atol=2e-3, rtol=2e-3), "r @ v mismatch vs reference"

    print("KERNEL_OK")
</pallas_src>

<mosaic_0001>
module attributes {stable_mosaic.version = 11 : i64} {
  func.func @coupled_attention_kernel(%arg0: memref<2x8x8xf32, #tpu.memory_space<vmem>>, %arg1: memref<2x8x8xf32, #tpu.memory_space<vmem>>, %arg2: memref<2x8x1xf32, #tpu.memory_space<vmem>>, %arg3: memref<8x24xf32, #tpu.memory_space<vmem>>, %arg4: memref<8x24xf32, #tpu.memory_space<vmem>>, %arg5: memref<2x8xf32, #tpu.memory_space<vmem>>, %arg6: memref<1x1x8xf32, #tpu.memory_space<vmem>>, %arg7: memref<2x8x8xf32, #tpu.memory_space<vmem>>, %arg8: memref<2x8xf32, #tpu.memory_space<vmem>>) attributes {dimension_semantics = [], scalar_prefetch = 0 : i64, scratch_operands = 0 : i64, tpu.core_type = #tpu.core_type<tc>} {
    %c0 = arith.constant 0 : index
    %c0_0 = arith.constant 0 : index
    %c0_1 = arith.constant 0 : index
    %0 = vector.load %arg2[%c0, %c0_0, %c0_1] : memref<2x8x1xf32, #tpu.memory_space<vmem>>, vector<2x8x1xf32>
    %c0_2 = arith.constant 0 : index
    %c0_3 = arith.constant 0 : index
    %c0_4 = arith.constant 0 : index
    %1 = vector.load %arg0[%c0_2, %c0_3, %c0_4] : memref<2x8x8xf32, #tpu.memory_space<vmem>>, vector<2x8x8xf32>
    %c0_5 = arith.constant 0 : index
    %c0_6 = arith.constant 0 : index
    %c0_7 = arith.constant 0 : index
    %2 = vector.load %arg1[%c0_5, %c0_6, %c0_7] : memref<2x8x8xf32, #tpu.memory_space<vmem>>, vector<2x8x8xf32>
    "tpu.trace_start"() <{level = 10 : i32, message = "bli,bik->blk"}> : () -> ()
    %cst = arith.constant dense<0.000000e+00> : vector<2x8x8xf32>
    %3 = tpu.matmul %1, %2, %cst {dimension_numbers = #tpu.dot_dimension_numbers<[2], [1], [1], [2], [0, 0, 0, 1, 1, 2], [0], [0]>} : vector<2x8x8xf32>, vector<2x8x8xf32>, vector<2x8x8xf32> -> vector<2x8x8xf32>
    "tpu.trace_stop"() : () -> ()
    %4 = math.tanh %3 : vector<2x8x8xf32>
    %5 = vector.broadcast %0 : vector<2x8x1xf32> to vector<2x8x8xf32>
    %6 = arith.mulf %4, %5 : vector<2x8x8xf32>
    %7 = vector.shape_cast %6 : vector<2x8x8xf32> to vector<16x8xf32>
    %c0_8 = arith.constant 0 : index
    %c0_9 = arith.constant 0 : index
    %8 = vector.load %arg3[%c0_8, %c0_9] : memref<8x24xf32, #tpu.memory_space<vmem>>, vector<8x24xf32>
    %cst_10 = arith.constant dense<0.000000e+00> : vector<16x24xf32>
    %9 = tpu.matmul %7, %8, %cst_10 {dimension_numbers = #tpu.dot_dimension_numbers<[1], [0], [0], [1], [0, 0, 1, 1], [], []>} : vector<16x8xf32>, vector<8x24xf32>, vector<16x24xf32> -> vector<16x24xf32>
    %10 = vector.shape_cast %9 : vector<16x24xf32> to vector<2x8x24xf32>
    %c0_11 = arith.constant 0 : index
    %c0_12 = arith.constant 0 : index
    %11 = vector.load %arg4[%c0_11, %c0_12] : memref<8x24xf32, #tpu.memory_space<vmem>>, vector<8x24xf32>
    %c0_13 = arith.constant 0 : index
    %c0_14 = arith.constant 0 : index
    %12 = vector.load %arg5[%c0_13, %c0_14] : memref<2x8xf32, #tpu.memory_space<vmem>>, vector<2x8xf32>
    %13 = vector.extract_strided_slice %10 {offsets = [0, 0, 0], sizes = [2, 1, 24], strides = [1, 1, 1]} : vector<2x8x24xf32> to vector<2x1x24xf32>
    %14 = vector.shape_cast %13 : vector<2x1x24xf32> to vector<2x24xf32>
    %cst_15 = arith.constant dense<0.000000e+00> : vector<2x24xf32>
    %15 = tpu.matmul %12, %11, %cst_15 {dimension_numbers = #tpu.dot_dimension_numbers<[1], [0], [0], [1], [0, 0, 1, 1], [], []>} : vector<2x8xf32>, vector<8x24xf32>, vector<2x24xf32> -> vector<2x24xf32>
    %16 = vector.extract_strided_slice %14 {offsets = [0, 0], sizes = [2, 8], strides = [1, 1]} : vector<2x24xf32> to vector<2x8xf32>
    %17 = vector.extract_strided_slice %15 {offsets = [0, 0], sizes = [2, 8], strides = [1, 1]} : vector<2x24xf32> to vector<2x8xf32>
    %18 = arith.addf %16, %17 : vector<2x8xf32>
    %19 = arith.negf %18 : vector<2x8xf32>
    %20 = math.exp %19 : vector<2x8xf32>
    %cst_16 = arith.constant 1.000000e+00 : f32
    %21 = vector.broadcast %cst_16 : f32 to vector<2x8xf32>
    %22 = arith.addf %21, %20 : vector<2x8xf32>
    %23 = arith.divf %21, %22 : vector<2x8xf32>
    %24 = vector.extract_strided_slice %14 {offsets = [0, 8], sizes = [2, 8], strides = [1, 1]} : vector<2x24xf32> to vector<2x8xf32>
    %25 = vector.extract_strided_slice %15 {offsets = [0, 8], sizes = [2, 8], strides = [1, 1]} : vector<2x24xf32> to vector<2x8xf32>
    %26 = arith.addf %24, %25 : vector<2x8xf32>
    %27 = arith.negf %26 : vector<2x8xf32>
    %28 = math.exp %27 : vector<2x8xf32>
    %cst_17 = arith.constant 1.000000e+00 : f32
    %29 = vector.broadcast %cst_17 : f32 to vector<2x8xf32>
    %30 = arith.addf %29, %28 : vector<2x8xf32>
    %31 = arith.divf %29, %30 : vector<2x8xf32>
    %32 = vector.extract_strided_slice %14 {offsets = [0, 16], sizes = [2, 8], strides = [1, 1]} : vector<2x24xf32> to vector<2x8xf32>
    %33 = vector.extract_strided_slice %15 {offsets = [0, 16], sizes = [2, 8], strides = [1, 1]} : vector<2x24xf32> to vector<2x8xf32>
    %34 = arith.mulf %23, %33 : vector<2x8xf32>
    %35 = arith.addf %32, %34 : vector<2x8xf32>
    %36 = math.tanh %35 : vector<2x8xf32>
    %cst_18 = arith.constant 1.000000e+00 : f32
    %37 = vector.broadcast %cst_18 : f32 to vector<2x8xf32>
    %38 = arith.subf %37, %31 : vector<2x8xf32>
    %39 = arith.mulf %38, %36 : vector<2x8xf32>
    %40 = arith.mulf %31, %12 : vector<2x8xf32>
    %41 = arith.addf %39, %40 : vector<2x8xf32>
    %42 = vector.extract_strided_slice %0 {offsets = [0, 0, 0], sizes = [2, 1, 1], strides = [1, 1, 1]} : vector<2x8x1xf32> to vector<2x1x1xf32>
    %43 = vector.shape_cast %42 : vector<2x1x1xf32> to vector<2x1xf32>
    %44 = vector.broadcast %43 : vector<2x1xf32> to vector<2x8xf32>
    %45 = arith.mulf %41, %44 : vector<2x8xf32>
    %c0_19 = arith.constant 0 : index
    %c0_20 = arith.constant 0 : index
    %c0_21 = arith.constant 0 : index
    %46 = vector.load %arg7[%c0_19, %c0_20, %c0_21] : memref<2x8x8xf32, #tpu.memory_space<vmem>>, vector<2x1x8xf32>
    %47 = vector.shape_cast %46 : vector<2x1x8xf32> to vector<2x8xf32>
    %48 = vector.shape_cast %45 : vector<2x8xf32> to vector<2x1x8xf32>
    tpu.vector_store %arg7[%c0_19, %c0_20, %c0_21], %48 {strides = array<i32>} : memref<2x8x8xf32, #tpu.memory_space<vmem>>, vector<2x1x8xf32>,
    %49 = vector.extract_strided_slice %10 {offsets = [0, 1, 0], sizes = [2, 1, 24], strides = [1, 1, 1]} : vector<2x8x24xf32> to vector<2x1x24xf32>
    %50 = vector.shape_cast %49 : vector<2x1x24xf32> to vector<2x24xf32>
    %cst_22 = arith.constant dense<0.000000e+00> : vector<2x24xf32>
    %51 = tpu.matmul %41, %11, %cst_22 {dimension_numbers = #tpu.dot_dimension_numbers<[1], [0], [0], [1], [0, 0, 1, 1], [], []>} : vector<2x8xf32>, vector<8x24xf32>, vector<2x24xf32> -> vector<2x24xf32>
    %52 = vector.extract_strided_slice %50 {offsets = [0, 0], sizes = [2, 8], strides = [1, 1]} : vector<2x24xf32> to vector<2x8xf32>
    %53 = vector.extract_strided_slice %51 {offsets = [0, 0], sizes = [2, 8], strides = [1, 1]} : vector<2x24xf32> to vector<2x8xf32>
    %54 = arith.addf %52, %53 : vector<2x8xf32>
    %55 = arith.negf %54 : vector<2x8xf32>
    %56 = math.exp %55 : vector<2x8xf32>
    %cst_23 = arith.constant 1.000000e+00 : f32
    %57 = vector.broadcast %cst_23 : f32 to vector<2x8xf32>
    %58 = arith.addf %57, %56 : vector<2x8xf32>
    %59 = arith.divf %57, %58 : vector<2x8xf32>
    %60 = vector.extract_strided_slice %50 {offsets = [0, 8], sizes = [2, 8], strides = [1, 1]} : vector<2x24xf32> to vector<2x8xf32>
    %61 = vector.extract_strided_slice %51 {offsets = [0, 8], sizes = [2, 8], strides = [1, 1]} : vector<2x24xf32> to vector<2x8xf32>
    %62 = arith.addf %60, %61 : vector<2x8xf32>
    %63 = arith.negf %62 : vector<2x8xf32>
    %64 = math.exp %63 : vector<2x8xf32>
    %cst_24 = arith.constant 1.000000e+00 : f32
    %65 = vector.broadcast %cst_24 : f32 to vector<2x8xf32>
    %66 = arith.addf %65, %64 : vector<2x8xf32>
    %67 = arith.divf %65, %66 : vector<2x8xf32>
    %68 = vector.extract_strided_slice %50 {offsets = [0, 16], sizes = [2, 8], strides = [1, 1]} : vector<2x24xf32> to vector<2x8xf32>
    %69 = vector.extract_strided_slice %51 {offsets = [0, 16], sizes = [2, 8], strides = [1, 1]} : vector<2x24xf32> to vector<2x8xf32>
    %70 = arith.mulf %59, %69 : vector<2x8xf32>
    %71 = arith.addf %68, %70 : vector<2x8xf32>
    %72 = math.tanh %71 : vector<2x8xf32>
    %cst_25 = arith.constant 1.000000e+00 : f32
    %73 = vector.broadcast %cst_25 : f32 to vector<2x8xf32>
    %74 = arith.subf %73, %67 : vector<2x8xf32>
    %75 = arith.mulf %74, %72 : vector<2x8xf32>
    %76 = arith.mulf %67, %41 : vector<2x8xf32>
    %77 = arith.addf %75, %76 : vector<2x8xf32>
    %78 = vector.extract_strided_slice %0 {offsets = [0, 1, 0], sizes = [2, 1, 1], strides = [1, 1, 1]} : vector<2x8x1xf32> to vector<2x1x1xf32>
    %79 = vector.shape_cast %78 : vector<2x1x1xf32> to vector<2x1xf32>
    %80 = vector.broadcast %79 : vector<2x1xf32> to vector<2x8xf32>
    %81 = arith.mulf %77, %80 : vector<2x8xf32>
    %c0_26 = arith.constant 0 : index
    %c1 = arith.constant 1 : index
    %c0_27 = arith.constant 0 : index
    %82 = vector.load %arg7[%c0_26, %c1, %c0_27] : memref<2x8x8xf32, #tpu.memory_space<vmem>>, vector<2x1x8xf32>
    %83 = vector.shape_cast %82 : vector<2x1x8xf32> to vector<2x8xf32>
    %84 = vector.shape_cast %81 : vector<2x8xf32> to vector<2x1x8xf32>
    tpu.vector_store %arg7[%c0_26, %c1, %c0_27], %84 {strides = array<i32>} : memref<2x8x8xf32, #tpu.memory_space<vmem>>, vector<2x1x8xf32>,
    %85 = vector.extract_strided_slice %10 {offsets = [0, 2, 0], sizes = [2, 1, 24], strides = [1, 1, 1]} : vector<2x8x24xf32> to vector<2x1x24xf32>
    %86 = vector.shape_cast %85 : vector<2x1x24xf32> to vector<2x24xf32>
    %cst_28 = arith.constant dense<0.000000e+00> : vector<2x24xf32>
    %87 = tpu.matmul %77, %11, %cst_28 {dimension_numbers = #tpu.dot_dimension_numbers<[1], [0], [0], [1], [0, 0, 1, 1], [], []>} : vector<2x8xf32>, vector<8x24xf32>, vector<2x24xf32> -> vector<2x24xf32>
    %88 = vector.extract_strided_slice %86 {offsets = [0, 0], sizes = [2, 8], strides = [1, 1]} : vector<2x24xf32> to vector<2x8xf32>
    %89 = vector.extract_strided_slice %87 {offsets = [0, 0], sizes = [2, 8], strides = [1, 1]} : vector<2x24xf32> to vector<2x8xf32>
    %90 = arith.addf %88, %89 : vector<2x8xf32>
    %91 = arith.negf %90 : vector<2x8xf32>
    %92 = math.exp %91 : vector<2x8xf32>
    %cst_29 = arith.constant 1.000000e+00 : f32
    %93 = vector.broadcast %cst_29 : f32 to vector<2x8xf32>
    %94 = arith.addf %93, %92 : vector<2x8xf32>
    %95 = arith.divf %93, %94 : vector<2x8xf32>
    %96 = vector.extract_strided_slice %86 {offsets = [0, 8], sizes = [2, 8], strides = [1, 1]} : vector<2x24xf32> to vector<2x8xf32>
    %97 = vector.extract_strided_slice %87 {offsets = [0, 8], sizes = [2, 8], strides = [1, 1]} : vector<2x24xf32> to vector<2x8xf32>
    %98 = arith.addf %96, %97 : vector<2x8xf32>
    %99 = arith.negf %98 : vector<2x8xf32>
    %100 = math.exp %99 : vector<2x8xf32>
    %cst_30 = arith.constant 1.000000e+00 : f32
    %101 = vector.broadcast %cst_30 : f32 to vector<2x8xf32>
    %102 = arith.addf %101, %100 : vector<2x8xf32>
    %103 = arith.divf %101, %102 : vector<2x8xf32>
    %104 = vector.extract_strided_slice %86 {offsets = [0, 16], sizes = [2, 8], strides = [1, 1]} : vector<2x24xf32> to vector<2x8xf32>
    %105 = vector.extract_strided_slice %87 {offsets = [0, 16], sizes = [2, 8], strides = [1, 1]} : vector<2x24xf32> to vector<2x8xf32>
    %106 = arith.mulf %95, %105 : vector<2x8xf32>
    %107 = arith.addf %104, %106 : vector<2x8xf32>
    %108 = math.tanh %107 : vector<2x8xf32>
    %cst_31 = arith.constant 1.000000e+00 : f32
    %109 = vector.broadcast %cst_31 : f32 to vector<2x8xf32>
    %110 = arith.subf %109, %103 : vector<2x8xf32>
    %111 = arith.mulf %110, %108 : vector<2x8xf32>
    %112 = arith.mulf %103, %77 : vector<2x8xf32>
    %113 = arith.addf %111, %112 : vector<2x8xf32>
    %114 = vector.extract_strided_slice %0 {offsets = [0, 2, 0], sizes = [2, 1, 1], strides = [1, 1, 1]} : vector<2x8x1xf32> to vector<2x1x1xf32>
    %115 = vector.shape_cast %114 : vector<2x1x1xf32> to vector<2x1xf32>
    %116 = vector.broadcast %115 : vector<2x1xf32> to vector<2x8xf32>
    %117 = arith.mulf %113, %116 : vector<2x8xf32>
    %c0_32 = arith.constant 0 : index
    %c2 = arith.constant 2 : index
    %c0_33 = arith.constant 0 : index
    %118 = vector.load %arg7[%c0_32, %c2, %c0_33] : memref<2x8x8xf32, #tpu.memory_space<vmem>>, vector<2x1x8xf32>
    %119 = vector.shape_cast %118 : vector<2x1x8xf32> to vector<2x8xf32>
    %120 = vector.shape_cast %117 : vector<2x8xf32> to vector<2x1x8xf32>
    tpu.vector_store %arg7[%c0_32, %c2, %c0_33], %120 {strides = array<i32>} : memref<2x8x8xf32, #tpu.memory_space<vmem>>, vector<2x1x8xf32>,
    %121 = vector.extract_strided_slice %10 {offsets = [0, 3, 0], sizes = [2, 1, 24], strides = [1, 1, 1]} : vector<2x8x24xf32> to vector<2x1x24xf32>
    %122 = vector.shape_cast %121 : vector<2x1x24xf32> to vector<2x24xf32>
    %cst_34 = arith.constant dense<0.000000e+00> : vector<2x24xf32>
    %123 = tpu.matmul %113, %11, %cst_34 {dimension_numbers = #tpu.dot_dimension_numbers<[1], [0], [0], [1], [0, 0, 1, 1], [], []>} : vector<2x8xf32>, vector<8x24xf32>, vector<2x24xf32> -> vector<2x24xf32>
    %124 = vector.extract_strided_slice %122 {offsets = [0, 0], sizes = [2, 8], strides = [1, 1]} : vector<2x24xf32> to vector<2x8xf32>
    %125 = vector.extract_strided_slice %123 {offsets = [0, 0], sizes = [2, 8], strides = [1, 1]} : vector<2x24xf32> to vector<2x8xf32>
    %126 = arith.addf %124, %125 : vector<2x8xf32>
    %127 = arith.negf %126 : vector<2x8xf32>
    %128 = math.exp %127 : vector<2x8xf32>
    %cst_35 = arith.constant 1.000000e+00 : f32
    %129 = vector.broadcast %cst_35 : f32 to vector<2x8xf32>
    %130 = arith.addf %129, %128 : vector<2x8xf32>
    %131 = arith.divf %129, %130 : vector<2x8xf32>
    %132 = vector.extract_strided_slice %122 {offsets = [0, 8], sizes = [2, 8], strides = [1, 1]} : vector<2x24xf32> to vector<2x8xf32>
    %133 = vector.extract_strided_slice %123 {offsets = [0, 8], sizes = [2, 8], strides = [1, 1]} : vector<2x24xf32> to vector<2x8xf32>
    %134 = arith.addf %132, %133 : vector<2x8xf32>
    %135 = arith.negf %134 : vector<2x8xf32>
    %136 = math.exp %135 : vector<2x8xf32>
    %cst_36 = arith.constant 1.000000e+00 : f32
    %137 = vector.broadcast %cst_36 : f32 to vector<2x8xf32>
    %138 = arith.addf %137, %136 : vector<2x8xf32>
    %139 = arith.divf %137, %138 : vector<2x8xf32>
    %140 = vector.extract_strided_slice %122 {offsets = [0, 16], sizes = [2, 8], strides = [1, 1]} : vector<2x24xf32> to vector<2x8xf32>
    %141 = vector.extract_strided_slice %123 {offsets = [0, 16], sizes = [2, 8], strides = [1, 1]} : vector<2x24xf32> to vector<2x8xf32>
    %142 = arith.mulf %131, %141 : vector<2x8xf32>
    %143 = arith.addf %140, %142 : vector<2x8xf32>
    %144 = math.tanh %143 : vector<2x8xf32>
    %cst_37 = arith.constant 1.000000e+00 : f32
    %145 = vector.broadcast %cst_37 : f32 to vector<2x8xf32>
    %146 = arith.subf %145, %139 : vector<2x8xf32>
    %147 = arith.mulf %146, %144 : vector<2x8xf32>
    %148 = arith.mulf %139, %113 : vector<2x8xf32>
    %149 = arith.addf %147, %148 : vector<2x8xf32>
    %150 = vector.extract_strided_slice %0 {offsets = [0, 3, 0], sizes = [2, 1, 1], strides = [1, 1, 1]} : vector<2x8x1xf32> to vector<2x1x1xf32>
    %151 = vector.shape_cast %150 : vector<2x1x1xf32> to vector<2x1xf32>
    %152 = vector.broadcast %151 : vector<2x1xf32> to vector<2x8xf32>
    %153 = arith.mulf %149, %152 : vector<2x8xf32>
    %c0_38 = arith.constant 0 : index
    %c3 = arith.constant 3 : index
    %c0_39 = arith.constant 0 : index
    %154 = vector.load %arg7[%c0_38, %c3, %c0_39] : memref<2x8x8xf32, #tpu.memory_space<vmem>>, vector<2x1x8xf32>
    %155 = vector.shape_cast %154 : vector<2x1x8xf32> to vector<2x8xf32>
    %156 = vector.shape_cast %153 : vector<2x8xf32> to vector<2x1x8xf32>
    tpu.vector_store %arg7[%c0_38, %c3, %c0_39], %156 {strides = array<i32>} : memref<2x8x8xf32, #tpu.memory_space<vmem>>, vector<2x1x8xf32>,
    %157 = vector.extract_strided_slice %10 {offsets = [0, 4, 0], sizes = [2, 1, 24], strides = [1, 1, 1]} : vector<2x8x24xf32> to vector<2x1x24xf32>
    %158 = vector.shape_cast %157 : vector<2x1x24xf32> to vector<2x24xf32>
    %cst_40 = arith.constant dense<0.000000e+00> : vector<2x24xf32>
    %159 = tpu.matmul %149, %11, %cst_40 {dimension_numbers = #tpu.dot_dimension_numbers<[1], [0], [0], [1], [0, 0, 1, 1], [], []>} : vector<2x8xf32>, vector<8x24xf32>, vector<2x24xf32> -> vector<2x24xf32>
    %160 = vector.extract_strided_slice %158 {offsets = [0, 0], sizes = [2, 8], strides = [1, 1]} : vector<2x24xf32> to vector<2x8xf32>
    %161 = vector.extract_strided_slice %159 {offsets = [0, 0], sizes = [2, 8], strides = [1, 1]} : vector<2x24xf32> to vector<2x8xf32>
    %162 = arith.addf %160, %161 : vector<2x8xf32>
    %163 = arith.negf %162 : vector<2x8xf32>
    %164 = math.exp %163 : vector<2x8xf32>
    %cst_41 = arith.constant 1.000000e+00 : f32
    %165 = vector.broadcast %cst_41 : f32 to vector<2x8xf32>
    %166 = arith.addf %165, %164 : vector<2x8xf32>
    %167 = arith.divf %165, %166 : vector<2x8xf32>
    %168 = vector.extract_strided_slice %158 {offsets = [0, 8], sizes = [2, 8], strides = [1, 1]} : vector<2x24xf32> to vector<2x8xf32>
    %169 = vector.extract_strided_slice %159 {offsets = [0, 8], sizes = [2, 8], strides = [1, 1]} : vector<2x24xf32> to vector<2x8xf32>
    %170 = arith.addf %168, %169 : vector<2x8xf32>
    %171 = arith.negf %170 : vector<2x8xf32>
    %172 = math.exp %171 : vector<2x8xf32>
    %cst_42 = arith.constant 1.000000e+00 : f32
    %173 = vector.broadcast %cst_42 : f32 to vector<2x8xf32>
    %174 = arith.addf %173, %172 : vector<2x8xf32>
    %175 = arith.divf %173, %174 : vector<2x8xf32>
    %176 = vector.extract_strided_slice %158 {offsets = [0, 16], sizes = [2, 8], strides = [1, 1]} : vector<2x24xf32> to vector<2x8xf32>
    %177 = vector.extract_strided_slice %159 {offsets = [0, 16], sizes = [2, 8], strides = [1, 1]} : vector<2x24xf32> to vector<2x8xf32>
    %178 = arith.mulf %167, %177 : vector<2x8xf32>
    %179 = arith.addf %176, %178 : vector<2x8xf32>
    %180 = math.tanh %179 : vector<2x8xf32>
    %cst_43 = arith.constant 1.000000e+00 : f32
    %181 = vector.broadcast %cst_43 : f32 to vector<2x8xf32>
    %182 = arith.subf %181, %175 : vector<2x8xf32>
    %183 = arith.mulf %182, %180 : vector<2x8xf32>
    %184 = arith.mulf %175, %149 : vector<2x8xf32>
    %185 = arith.addf %183, %184 : vector<2x8xf32>
    %186 = vector.extract_strided_slice %0 {offsets = [0, 4, 0], sizes = [2, 1, 1], strides = [1, 1, 1]} : vector<2x8x1xf32> to vector<2x1x1xf32>
    %187 = vector.shape_cast %186 : vector<2x1x1xf32> to vector<2x1xf32>
    %188 = vector.broadcast %187 : vector<2x1xf32> to vector<2x8xf32>
    %189 = arith.mulf %185, %188 : vector<2x8xf32>
    %c0_44 = arith.constant 0 : index
    %c4 = arith.constant 4 : index
    %c0_45 = arith.constant 0 : index
    %190 = vector.load %arg7[%c0_44, %c4, %c0_45] : memref<2x8x8xf32, #tpu.memory_space<vmem>>, vector<2x1x8xf32>
    %191 = vector.shape_cast %190 : vector<2x1x8xf32> to vector<2x8xf32>
    %192 = vector.shape_cast %189 : vector<2x8xf32> to vector<2x1x8xf32>
    tpu.vector_store %arg7[%c0_44, %c4, %c0_45], %192 {strides = array<i32>} : memref<2x8x8xf32, #tpu.memory_space<vmem>>, vector<2x1x8xf32>,
    %193 = vector.extract_strided_slice %10 {offsets = [0, 5, 0], sizes = [2, 1, 24], strides = [1, 1, 1]} : vector<2x8x24xf32> to vector<2x1x24xf32>
    %194 = vector.shape_cast %193 : vector<2x1x24xf32> to vector<2x24xf32>
    %cst_46 = arith.constant dense<0.000000e+00> : vector<2x24xf32>
    %195 = tpu.matmul %185, %11, %cst_46 {dimension_numbers = #tpu.dot_dimension_numbers<[1], [0], [0], [1], [0, 0, 1, 1], [], []>} : vector<2x8xf32>, vector<8x24xf32>, vector<2x24xf32> -> vector<2x24xf32>
    %196 = vector.extract_strided_slice %194 {offsets = [0, 0], sizes = [2, 8], strides = [1, 1]} : vector<2x24xf32> to vector<2x8xf32>
    %197 = vector.extract_strided_slice %195 {offsets = [0, 0], sizes = [2, 8], strides = [1, 1]} : vector<2x24xf32> to vector<2x8xf32>
    %198 = arith.addf %196, %197 : vector<2x8xf32>
    %199 = arith.negf %198 : vector<2x8xf32>
    %200 = math.exp %199 : vector<2x8xf32>
    %cst_47 = arith.constant 1.000000e+00 : f32
    %201 = vector.broadcast %cst_47 : f32 to vector<2x8xf32>
    %202 = arith.addf %201, %200 : vector<2x8xf32>
    %203 = arith.divf %201, %202 : vector<2x8xf32>
    %204 = vector.extract_strided_slice %194 {offsets = [0, 8], sizes = [2, 8], strides = [1, 1]} : vector<2x24xf32> to vector<2x8xf32>
    %205 = vector.extract_strided_slice %195 {offsets = [0, 8], sizes = [2, 8], strides = [1, 1]} : vector<2x24xf32> to vector<2x8xf32>
    %206 = arith.addf %204, %205 : vector<2x8xf32>
    %207 = arith.negf %206 : vector<2x8xf32>
    %208 = math.exp %207 : vector<2x8xf32>
    %cst_48 = arith.constant 1.000000e+00 : f32
    %209 = vector.broadcast %cst_48 : f32 to vector<2x8xf32>
    %210 = arith.addf %209, %208 : vector<2x8xf32>
    %211 = arith.divf %209, %210 : vector<2x8xf32>
    %212 = vector.extract_strided_slice %194 {offsets = [0, 16], sizes = [2, 8], strides = [1, 1]} : vector<2x24xf32> to vector<2x8xf32>
    %213 = vector.extract_strided_slice %195 {offsets = [0, 16], sizes = [2, 8], strides = [1, 1]} : vector<2x24xf32> to vector<2x8xf32>
    %214 = arith.mulf %203, %213 : vector<2x8xf32>
    %215 = arith.addf %212, %214 : vector<2x8xf32>
    %216 = math.tanh %215 : vector<2x8xf32>
    %cst_49 = arith.constant 1.000000e+00 : f32
    %217 = vector.broadcast %cst_49 : f32 to vector<2x8xf32>
    %218 = arith.subf %217, %211 : vector<2x8xf32>
    %219 = arith.mulf %218, %216 : vector<2x8xf32>
    %220 = arith.mulf %211, %185 : vector<2x8xf32>
    %221 = arith.addf %219, %220 : vector<2x8xf32>
    %222 = vector.extract_strided_slice %0 {offsets = [0, 5, 0], sizes = [2, 1, 1], strides = [1, 1, 1]} : vector<2x8x1xf32> to vector<2x1x1xf32>
    %223 = vector.shape_cast %222 : vector<2x1x1xf32> to vector<2x1xf32>
    %224 = vector.broadcast %223 : vector<2x1xf32> to vector<2x8xf32>
    %225 = arith.mulf %221, %224 : vector<2x8xf32>
    %c0_50 = arith.constant 0 : index
    %c5 = arith.constant 5 : index
    %c0_51 = arith.constant 0 : index
    %226 = vector.load %arg7[%c0_50, %c5, %c0_51] : memref<2x8x8xf32, #tpu.memory_space<vmem>>, vector<2x1x8xf32>
    %227 = vector.shape_cast %226 : vector<2x1x8xf32> to vector<2x8xf32>
    %228 = vector.shape_cast %225 : vector<2x8xf32> to vector<2x1x8xf32>
    tpu.vector_store %arg7[%c0_50, %c5, %c0_51], %228 {strides = array<i32>} : memref<2x8x8xf32, #tpu.memory_space<vmem>>, vector<2x1x8xf32>,
    %229 = vector.extract_strided_slice %10 {offsets = [0, 6, 0], sizes = [2, 1, 24], strides = [1, 1, 1]} : vector<2x8x24xf32> to vector<2x1x24xf32>
    %230 = vector.shape_cast %229 : vector<2x1x24xf32> to vector<2x24xf32>
    %cst_52 = arith.constant dense<0.000000e+00> : vector<2x24xf32>
    %231 = tpu.matmul %221, %11, %cst_52 {dimension_numbers = #tpu.dot_dimension_numbers<[1], [0], [0], [1], [0, 0, 1, 1], [], []>} : vector<2x8xf32>, vector<8x24xf32>, vector<2x24xf32> -> vector<2x24xf32>
    %232 = vector.extract_strided_slice %230 {offsets = [0, 0], sizes = [2, 8], strides = [1, 1]} : vector<2x24xf32> to vector<2x8xf32>
    %233 = vector.extract_strided_slice %231 {offsets = [0, 0], sizes = [2, 8], strides = [1, 1]} : vector<2x24xf32> to vector<2x8xf32>
    %234 = arith.addf %232, %233 : vector<2x8xf32>
    %235 = arith.negf %234 : vector<2x8xf32>
    %236 = math.exp %235 : vector<2x8xf32>
    %cst_53 = arith.constant 1.000000e+00 : f32
    %237 = vector.broadcast %cst_53 : f32 to vector<2x8xf32>
    %238 = arith.addf %237, %236 : vector<2x8xf32>
    %239 = arith.divf %237, %238 : vector<2x8xf32>
    %240 = vector.extract_strided_slice %230 {offsets = [0, 8], sizes = [2, 8], strides = [1, 1]} : vector<2x24xf32> to vector<2x8xf32>
    %241 = vector.extract_strided_slice %231 {offsets = [0, 8], sizes = [2, 8], strides = [1, 1]} : vector<2x24xf32> to vector<2x8xf32>
    %242 = arith.addf %240, %241 : vector<2x8xf32>
    %243 = arith.negf %242 : vector<2x8xf32>
    %244 = math.exp %243 : vector<2x8xf32>
    %cst_54 = arith.constant 1.000000e+00 : f32
    %245 = vector.broadcast %cst_54 : f32 to vector<2x8xf32>
    %246 = arith.addf %245, %244 : vector<2x8xf32>
    %247 = arith.divf %245, %246 : vector<2x8xf32>
    %248 = vector.extract_strided_slice %230 {offsets = [0, 16], sizes = [2, 8], strides = [1, 1]} : vector<2x24xf32> to vector<2x8xf32>
    %249 = vector.extract_strided_slice %231 {offsets = [0, 16], sizes = [2, 8], strides = [1, 1]} : vector<2x24xf32> to vector<2x8xf32>
    %250 = arith.mulf %239, %249 : vector<2x8xf32>
    %251 = arith.addf %248, %250 : vector<2x8xf32>
    %252 = math.tanh %251 : vector<2x8xf32>
    %cst_55 = arith.constant 1.000000e+00 : f32
    %253 = vector.broadcast %cst_55 : f32 to vector<2x8xf32>
    %254 = arith.subf %253, %247 : vector<2x8xf32>
    %255 = arith.mulf %254, %252 : vector<2x8xf32>
    %256 = arith.mulf %247, %221 : vector<2x8xf32>
    %257 = arith.addf %255, %256 : vector<2x8xf32>
    %258 = vector.extract_strided_slice %0 {offsets = [0, 6, 0], sizes = [2, 1, 1], strides = [1, 1, 1]} : vector<2x8x1xf32> to vector<2x1x1xf32>
    %259 = vector.shape_cast %258 : vector<2x1x1xf32> to vector<2x1xf32>
    %260 = vector.broadcast %259 : vector<2x1xf32> to vector<2x8xf32>
    %261 = arith.mulf %257, %260 : vector<2x8xf32>
    %c0_56 = arith.constant 0 : index
    %c6 = arith.constant 6 : index
    %c0_57 = arith.constant 0 : index
    %262 = vector.load %arg7[%c0_56, %c6, %c0_57] : memref<2x8x8xf32, #tpu.memory_space<vmem>>, vector<2x1x8xf32>
    %263 = vector.shape_cast %262 : vector<2x1x8xf32> to vector<2x8xf32>
    %264 = vector.shape_cast %261 : vector<2x8xf32> to vector<2x1x8xf32>
    tpu.vector_store %arg7[%c0_56, %c6, %c0_57], %264 {strides = array<i32>} : memref<2x8x8xf32, #tpu.memory_space<vmem>>, vector<2x1x8xf32>,
    %265 = vector.extract_strided_slice %10 {offsets = [0, 7, 0], sizes = [2, 1, 24], strides = [1, 1, 1]} : vector<2x8x24xf32> to vector<2x1x24xf32>
    %266 = vector.shape_cast %265 : vector<2x1x24xf32> to vector<2x24xf32>
    %cst_58 = arith.constant dense<0.000000e+00> : vector<2x24xf32>
    %267 = tpu.matmul %257, %11, %cst_58 {dimension_numbers = #tpu.dot_dimension_numbers<[1], [0], [0], [1], [0, 0, 1, 1], [], []>} : vector<2x8xf32>, vector<8x24xf32>, vector<2x24xf32> -> vector<2x24xf32>
    %268 = vector.extract_strided_slice %266 {offsets = [0, 0], sizes = [2, 8], strides = [1, 1]} : vector<2x24xf32> to vector<2x8xf32>
    %269 = vector.extract_strided_slice %267 {offsets = [0, 0], sizes = [2, 8], strides = [1, 1]} : vector<2x24xf32> to vector<2x8xf32>
    %270 = arith.addf %268, %269 : vector<2x8xf32>
    %271 = arith.negf %270 : vector<2x8xf32>
    %272 = math.exp %271 : vector<2x8xf32>
    %cst_59 = arith.constant 1.000000e+00 : f32
    %273 = vector.broadcast %cst_59 : f32 to vector<2x8xf32>
    %274 = arith.addf %273, %272 : vector<2x8xf32>
    %275 = arith.divf %273, %274 : vector<2x8xf32>
    %276 = vector.extract_strided_slice %266 {offsets = [0, 8], sizes = [2, 8], strides = [1, 1]} : vector<2x24xf32> to vector<2x8xf32>
    %277 = vector.extract_strided_slice %267 {offsets = [0, 8], sizes = [2, 8], strides = [1, 1]} : vector<2x24xf32> to vector<2x8xf32>
    %278 = arith.addf %276, %277 : vector<2x8xf32>
    %279 = arith.negf %278 : vector<2x8xf32>
    %280 = math.exp %279 : vector<2x8xf32>
    %cst_60 = arith.constant 1.000000e+00 : f32
    %281 = vector.broadcast %cst_60 : f32 to vector<2x8xf32>
    %282 = arith.addf %281, %280 : vector<2x8xf32>
    %283 = arith.divf %281, %282 : vector<2x8xf32>
    %284 = vector.extract_strided_slice %266 {offsets = [0, 16], sizes = [2, 8], strides = [1, 1]} : vector<2x24xf32> to vector<2x8xf32>
    %285 = vector.extract_strided_slice %267 {offsets = [0, 16], sizes = [2, 8], strides = [1, 1]} : vector<2x24xf32> to vector<2x8xf32>
    %286 = arith.mulf %275, %285 : vector<2x8xf32>
    %287 = arith.addf %284, %286 : vector<2x8xf32>
    %288 = math.tanh %287 : vector<2x8xf32>
    %cst_61 = arith.constant 1.000000e+00 : f32
    %289 = vector.broadcast %cst_61 : f32 to vector<2x8xf32>
    %290 = arith.subf %289, %283 : vector<2x8xf32>
    %291 = arith.mulf %290, %288 : vector<2x8xf32>
    %292 = arith.mulf %283, %257 : vector<2x8xf32>
    %293 = arith.addf %291, %292 : vector<2x8xf32>
    %294 = vector.extract_strided_slice %0 {offsets = [0, 7, 0], sizes = [2, 1, 1], strides = [1, 1, 1]} : vector<2x8x1xf32> to vector<2x1x1xf32>
    %295 = vector.shape_cast %294 : vector<2x1x1xf32> to vector<2x1xf32>
    %296 = vector.broadcast %295 : vector<2x1xf32> to vector<2x8xf32>
    %297 = arith.mulf %293, %296 : vector<2x8xf32>
    %c0_62 = arith.constant 0 : index
    %c7 = arith.constant 7 : index
    %c0_63 = arith.constant 0 : index
    %298 = vector.load %arg7[%c0_62, %c7, %c0_63] : memref<2x8x8xf32, #tpu.memory_space<vmem>>, vector<2x1x8xf32>
    %299 = vector.shape_cast %298 : vector<2x1x8xf32> to vector<2x8xf32>
    %300 = vector.shape_cast %297 : vector<2x8xf32> to vector<2x1x8xf32>
    tpu.vector_store %arg7[%c0_62, %c7, %c0_63], %300 {strides = array<i32>} : memref<2x8x8xf32, #tpu.memory_space<vmem>>, vector<2x1x8xf32>,
    %c0_64 = arith.constant 0 : index
    %c0_65 = arith.constant 0 : index
    %c0_66 = arith.constant 0 : index
    %301 = vector.load %arg7[%c0_64, %c0_65, %c0_66] : memref<2x8x8xf32, #tpu.memory_space<vmem>>, vector<2x8x8xf32>
    %c0_67 = arith.constant 0 : index
    %c0_68 = arith.constant 0 : index
    %c0_69 = arith.constant 0 : index
    %302 = vector.load %arg6[%c0_67, %c0_68, %c0_69] : memref<1x1x8xf32, #tpu.memory_space<vmem>>, vector<1x1x8xf32>
    %303 = vector.broadcast %302 : vector<1x1x8xf32> to vector<2x8x8xf32>
    %304 = arith.mulf %301, %303 : vector<2x8x8xf32>
    %cst_70 = arith.constant dense<0.000000e+00> : vector<2x8xf32>
    %305 = vector.multi_reduction <add>, %304, %cst_70 [2] : vector<2x8x8xf32> to vector<2x8xf32>
    %c0_71 = arith.constant 0 : index
    %c0_72 = arith.constant 0 : index
    %306 = vector.load %arg8[%c0_71, %c0_72] : memref<2x8xf32, #tpu.memory_space<vmem>>, vector<2x8xf32>
    tpu.vector_store %arg8[%c0_71, %c0_72], %305 {strides = array<i32>} : memref<2x8xf32, #tpu.memory_space<vmem>>, vector<2x8xf32>,
    return
  }
}

</mosaic_0001>

<bundles_post_ra>
// kernel: tpu_custom_call.1
= control target key start
LH: loop header
LB: loop body
LE: loop exit
PB: predicated region body
PF: predicated region fallthrough
CT: control target
= control target key end

     0   :  { %14 = vsyncpa [#allocation3], 0  ;;  %s2235_s0 = inlined_call_operand.vmem [shape: f32[2,8,8], index: 0, kind: input, shape index: {}]   ;;  %s2236_s1 = inlined_call_operand.hbm [shape: f32[2,8,8], index: 1, kind: input, shape index: {}]   ;;  %s2237_s2 = inlined_call_operand.vmem [shape: f32[2,8,1], index: 2, kind: input, shape index: {}]   ;;  %s2238_s3 = inlined_call_operand.vmem [shape: f32[8,24], index: 3, kind: input, shape index: {}]   ;;  %s2239_s4 = inlined_call_operand.vmem [shape: f32[8,24], index: 4, kind: input, shape index: {}]   ;;  %s2240_s5 = inlined_call_operand.vmem [shape: f32[2,8], index: 5, kind: input, shape index: {}]   ;;  %s2241_s6 = inlined_call_operand.vmem [shape: f32[1,1,8], index: 6, kind: input, shape index: {}]   ;;  %s2242_s7 = inlined_call_operand.hbm [shape: f32[2,8,8], index: 7, kind: output, shape index: {0}]   ;;  %s2243_s8 = inlined_call_operand.hbm [shape: f32[2,8], index: 8, kind: output, shape index: {1}]  }
   0x1   :  { %15 = vsyncpa [#allocation4], 0 }
   0x2   :  { %16 = vsyncpa [#allocation7], 0  ;;  %s1851_s27 = smov [#allocation2]   ;;  %s1779_s9 = scalar_lea.hbm %s2236_s1, 256 }
   0x3   :  { %s24_s28 = sshll.u32 %s1851_s27, 4  ;;  %p1780_p0 = scmp.ne.s32.totalorder %s2236_s1, %s1779_s9  ;;  %s25_s28 = int_to_ptr.vmem [resolvable:$true] %s24_s28 }
   0x4   :  { %p1783_p1 = scmp.lt.u32.totalorder %s1779_s9, %s2236_s1 }
   0x6   :  { %p1785_p2 = pnand %p1783_p1, %p1780_p0 }
   0x8   :  { %1788 = shalt.err (!%p1785_p2)
}
   0x9   :  { %s1789_s14 = scalar_lea.vmem %s25_s28, 256  ;;  %p1794_p4 = scmp.lt.s32.totalorder %s25_s28, %s25_s28 }
   0xa   :  { %p1790_p3 = scmp.ne.s32.totalorder %s25_s28, %s1789_s14  ;;  %p1795_p5 = scmp.lt.s32.totalorder %s1789_s14, %s1789_s14 }
   0xc   :  { %p1796_p6 = por %p1795_p5, %p1794_p4 }
   0xe   :  { %p1797_p7 = pnand %p1796_p6, %p1790_p3 }
  0x10   :  { %1800 = shalt.err (!%p1797_p7)
}
  0x11   :  { %s1852_s15 = smov 128   ;;  %s1853_s16 = smov 8  }
  0x12   :  { %30 = dma.hbm_to_vmem [thread:$0]  %s2236_s1, 256, %s25_s28, [#allocation3], %s1852_s15, %s1852_s15, %s1853_s16  }
  0x13   :  { %1845 = dma.done.wait [#allocation3], 256  }
  0x14   :  { %1846 = vsyncadd [#allocation3], 4294967040  ;;  %v1854_v0 = vmov 0.0   ;;  %vm1855_vm0 = vmmov 0   ;;  %v1856_v1 = vmov 0   ;;  %vm50_vm1 = vcmask 64512  }
  0x15   :  { %1612 = vmatprep.subr.mxu0 %v1854_v0  ;;  %1617 = vmatprep.subr.mxu1 %v1854_v0  ;;  %v48_v2 = vld [vmem:[#allocation2] sm:$0xff]  ;;  %v49_v3 = vld [vmem:[#allocation2 + $0x8] sm:$0xff]  ;;  %s1859_s29 = smov 120   ;;  %vm445_vm2 = vcmask 1041409   ;;  %vm439_vm3 = vcmask 57344   ;;  %vm588_vm4 = vcmask 58369  }
  0x16   :  { %1614 = vmatprep.mubr.msk.f32.mxu0 %vm1855_vm0, %v1854_v0  ;;  %1619 = vmatprep.mubr.msk.f32.mxu1 %vm1855_vm0, %v1854_v0  ;;  %v46_v4 = vld [vmem:[%s2235_s0] sm:$0xff]  ;;  %v47_v5 = vld [vmem:[%s2235_s0 + $0x8] sm:$0xff]  ;;  %vm738_vm5 = vcmask 59394   ;;  %vm889_vm6 = vcmask 60419   ;;  %vm1040_vm7 = vcmask 61444   ;;  %vm1191_vm8 = vcmask 62469  }
  0x17   :  { %1678 = vset.pattern.permute.xlu0 %v1856_v1  ;;  %1613 = vmatpush3.msra.mxu0 %v48_v2  ;;  %v44_v6 = vld [vmem:[%s2237_s2] sm:$0xff]  ;;  %v45_v9 = vld [vmem:[%s2237_s2 + $0x8] sm:$0xff]  ;;  %s1857_s2 = smov 112   ;;  %vm1342_vm9 = vcmask 63494   ;;  %vm1493_vm10 = vcmask 64519   ;;  %s1860_s10 = smov [#allocation5]  }
  0x18   :  { %1618 = vmatpush3.msra.mxu1 %v49_v3  ;;  %1615 = vmatmul.mubr.msk.f32.vlgmr.msra.gmra.mrb[0].mxu0 %vm50_vm1, %v46_v4  ;;  %v1942_v7 = vld [vmem:[%s2239_s4] sm:$0xff]  ;;  %s1534_s11 = sshll.u32 %s1860_s10, 4  ;;  %s1535_s11 = int_to_ptr.vmem [resolvable:$true] %s1534_s11 }
  0x19   :  { %1620 = vmatmul.mubr.msk.f32.vlgmr.msra.gmra.mrb[0].mxu1 %vm50_vm1, %v47_v5  ;;  %201 = vperm.xlu0 %1678, %v44_v6   ;;  %v294_v8 = vld [vmem:[%s2240_s5] sm:$0x3]  ;;  %s1801_s12 = scalar_lea.vmem %s1535_s11, 256  ;;  %p1806_p9 = scmp.lt.s32.totalorder %s1535_s11, %s1535_s11 }
  0x1a   :  { %1627 = vmatprep.subr.mxu1 %v1854_v0  ;;  %1629 = vmatprep.mubr.msk.f32.mxu1 %vm1855_vm0, %v1854_v0  ;;  %v211_v10 = vld [vmem:[%s2238_s3] sm:$0xff]  ;;  %s1858_s3 = smov 16   ;;  %v418_v40 = vrot.slane %v294_v8, 1  ;;  %p1802_p8 = scmp.ne.s32.totalorder %s1535_s11, %s1801_s12 }
  0x1b   :  { %1628 = vmatpush3.msra.mxu1 %v1942_v7  ;;  %1622 = vmatprep.subr.mxu0 %v211_v10  ;;  %p1807_p10 = scmp.lt.s32.totalorder %s1801_s12, %s1801_s12 }
  0x1c   :  { %1637 = vmatprep.subr.mxu1 %v1854_v0  ;;  %1623 = vmatpush3.msra.mxu0 %v211_v10 }
  0x1d   :  { %1630 = vmatmul.mubr.msk.f32.vlgmr.msra.gmra.mrb[2].mxu1 %vm50_vm1, %v294_v8  ;;  %206 = vperm.xlu0 %1678, %v45_v9   ;;  %p1808_p11 = por %p1807_p10, %p1806_p9 }
  0x1e   :  { %1638 = vmatpush3.msra.mxu1 %v1942_v7  ;;  %1639 = vmatprep.mubr.msk.f32.mxu1 %vm1855_vm0, %v1854_v0 }
  0x1f   :  { %1647 = vmatprep.subr.mxu1 %v1854_v0  ;;  %1632 = vmatprep.subr.mxu0 %v1854_v0  ;;  %p1809_p12 = pnand %p1808_p11, %p1802_p8 }
  0x98   :  { %v1964_v18 = vpop.permute.xlu0 %201 }
  0x9c   :  { %v1968_v21 = vpop.permute.xlu0 %206 }
  0xeb   :  { %v120_v11 = vpop.f32.mrb[0].mxu0 }
  0xec   :  { %v193_v12 = vpop.f32.mrb[0].mxu1  ;;  %1679 = vtanh.f32 %v120_v11  ;;  %v1616_v13 = vpop.f32.mrb[1].mxu0 }
  0xed   :  { %v1621_v14 = vpop.f32.mrb[1].mxu1  ;;  %1681 = vtanh.f32 %v193_v12 }
  0xf0   :  { %v364_v15 = vpop.f32.mrb[2].mxu1 }
  0xf1   :  { %v369_v16 = vrot.slane %v364_v15, 1  ;;  %v1631_v17 = vpop.f32.mrb[3].mxu1 }
  0xf3   :  { %388 = vrot.lane.b32.xlu1 %v369_v16, %s1857_s2 }
  0xf6   :  { %v1680_v19 = vpop.eup %1679 }
  0xf7   :  { %386 = vrot.lane.b32.xlu1 %v364_v15, %s1857_s2  ;;  %v1682_v20 = vpop.eup %1681  ;;  %v209_v22 = vmul.f32 %v1680_v19, %v1964_v18 }
  0xf8   :  { %v210_v23 = vmul.f32 %v1682_v20, %v1968_v21 }
  0xf9   :  { %1624 = vmatprep.mubr.msk.f32.mxu0 %vm50_vm1, %v209_v22 }
  0xfa   :  { %1625 = vmatmul.mubr.msk.f32.vlgmr.msra.gmra.mrb[2].mxu0 %vm50_vm1, %v210_v23 }
  0xfb   :  { %1633 = vmatpush3.msra.mxu0 %v1942_v7  ;;  %1634 = vmatprep.mubr.msk.f32.mxu0 %vm1855_vm0, %v1854_v0 }
  0xfc   :  { %1642 = vmatprep.subr.mxu0 %v1854_v0 }
 0x165   :  { %v389_v34 = vpop.permute.xlu1 %388 }
 0x169   :  { %v387_v38 = vpop.permute.xlu1 %386 }
 0x1cd   :  { %v1978_v24 = vpop.f32.mrb[2].mxu0 }
 0x1ce   :  { %v1980_v25 = vpop.f32.mrb[3].mxu0  ;;  %v373_v26 = vadd.f32 %v1978_v24, %v369_v16 }
 0x1cf   :  { %v372_v27 = vadd.f32 %v364_v15, %v1980_v25 }
 0x1d0   :  { %v1566_v28 = vmul.f32 -1.442695, %v373_v26 }
 0x1d1   :  { %v1565_v29 = vmul.f32 -1.442695, %v372_v27 }
 0x1d2   :  { %1683 = vpow2.f32 %v1566_v28 }
 0x1d3   :  { %1685 = vpow2.f32 %v1565_v29 }
 0x1dc   :  { %v1684_v30 = vpop.eup %1683 }
 0x1dd   :  { %v1686_v31 = vpop.eup %1685  ;;  %v381_v32 = vadd.f32 1.0, %v1684_v30 }
 0x1de   :  { %v380_v33 = vadd.f32 1.0, %v1686_v31 }
 0x1df   :  { %1687 = vrcp.f32 %v381_v32 }
 0x1e0   :  { %1689 = vrcp.f32 %v380_v33 }
 0x1e9   :  { %v1688_v35 = vpop.eup %1687 }
 0x1ea   :  { %v1690_v36 = vpop.eup %1689  ;;  %v393_v37 = vmul.f32 %v1688_v35, %v389_v34  ;;  %v407_v48 = vsub.f32 1.0, %v1688_v35 }
 0x1eb   :  { %v392_v39 = vmul.f32 %v1690_v36, %v387_v38  ;;  %v406_v54 = vsub.f32 1.0, %v1690_v36 }
 0x1ec   :  { %398 = vrot.lane.b32.xlu0 %v393_v37, %s1858_s3 }
 0x1ed   :  { %396 = vrot.lane.b32.xlu1 %v392_v39, %s1858_s3 }
 0x1f1   :  { %421 = vrot.lane.b32.xlu1 %v418_v40, %s1853_s16 }
 0x1f5   :  { %419 = vrot.lane.b32.xlu1 %v294_v8, %s1853_s16 }
 0x25e   :  { %v399_v41 = vpop.permute.xlu0 %398 }
 0x25f   :  { %v403_v42 = vadd.f32 %v1978_v24, %v399_v41  ;;  %v397_v43 = vpop.permute.xlu1 %396 }
 0x260   :  { %v402_v44 = vadd.f32 %v397_v43, %v1980_v25 }
 0x261   :  { %1691 = vtanh.f32 %v403_v42 }
 0x262   :  { %1693 = vtanh.f32 %v402_v44 }
 0x263   :  { %v422_v47 = vpop.permute.xlu1 %421 }
 0x264   :  { %v426_v50 = vmul.f32 %v1688_v35, %v422_v47 }
 0x267   :  { %v420_v52 = vpop.permute.xlu1 %419 }
 0x268   :  { %v425_v56 = vmul.f32 %v1690_v36, %v420_v52 }
 0x26b   :  { %v1692_v45 = vpop.eup %1691 }
 0x26c   :  { %412 = vrot.lane.b32.xlu0 %v1692_v45, %s1859_s29  ;;  %v1694_v46 = vpop.eup %1693 }
 0x270   :  { %410 = vrot.lane.b32.xlu0 %v1694_v46, %s1859_s29 }
 0x2de   :  { %v413_v49 = vpop.permute.xlu0 %412 }
 0x2df   :  { %v417_v51 = vmul.f32 %v413_v49, %v407_v48 }
 0x2e1   :  { %v1992_v53 = vadd.f32 %v426_v50, %v417_v51 }
 0x2e2   :  { %v411_v55 = vpop.permute.xlu0 %410 }
 0x2e3   :  { %v416_v57 = vmul.f32 %v411_v55, %v406_v54  ;;  %v444_v58 = vrot.slane %v1992_v53, 7 }
 0x2e5   :  { %v1995_v59 = vadd.f32 %v425_v56, %v416_v57 }
 0x2e7   :  { %v446_v60 = vsel %vm445_vm2, %v444_v58, %v1995_v59  ;;  %v571_v30 = vrot.slane %v1995_v59, 7 }
 0x2e8   :  { %447 = vrot.lane.b32.xlu0 %v446_v60, %s1859_s29 }
 0x35a   :  { %v448_v61 = vpop.permute.xlu0 %447 }
 0x35b   :  { %1635 = vmatmul.mubr.msk.f32.vlgmr.msra.gmra.mrb[4].mxu0 %vm50_vm1, %v448_v61 }
 0x35c   :  { %1643 = vmatpush3.msra.mxu0 %v1942_v7  ;;  %1644 = vmatprep.mubr.msk.f32.mxu0 %vm1855_vm0, %v1854_v0 }
 0x35d   :  { %1652 = vmatprep.subr.mxu0 %v1854_v0 }
 0x42e   :  { %v517_v62 = vpop.f32.mrb[4].mxu0 }
 0x42f   :  { %v522_v63 = vrot.slane %v517_v62, 7  ;;  %v526_v1 = vadd.f32 %v1978_v24, %v517_v62  ;;  %541 = vrot.lane.b32.xlu0 %v517_v62, %s1857_s2  ;;  %v1636_v2 = vpop.f32.mrb[5].mxu0 }
 0x431   :  { %v525_v3 = vadd.f32 %v522_v63, %v1980_v25  ;;  %539 = vrot.lane.b32.xlu1 %v522_v63, %s1857_s2  ;;  %v1569_v4 = vmul.f32 -1.442695, %v526_v1 }
 0x433   :  { %v1568_v5 = vmul.f32 -1.442695, %v525_v3  ;;  %1695 = vpow2.f32 %v1569_v4 }
 0x435   :  { %1697 = vpow2.f32 %v1568_v5 }
 0x43d   :  { %v1696_v6 = vpop.eup %1695 }
 0x43e   :  { %v534_v9 = vadd.f32 1.0, %v1696_v6 }
 0x43f   :  { %v1698_v8 = vpop.eup %1697 }
 0x440   :  { %v533_v10 = vadd.f32 1.0, %v1698_v8  ;;  %1699 = vrcp.f32 %v534_v9 }
 0x442   :  { %1701 = vrcp.f32 %v533_v10 }
 0x44a   :  { %v1700_v11 = vpop.eup %1699 }
 0x44b   :  { %v560_v28 = vsub.f32 1.0, %v1700_v11  ;;  %v575_v35 = vmul.f32 %v1700_v11, %v444_v58 }
 0x44c   :  { %v1702_v14 = vpop.eup %1701 }
 0x44d   :  { %v559_v29 = vsub.f32 1.0, %v1702_v14  ;;  %v574_v33 = vmul.f32 %v1702_v14, %v571_v30 }
 0x4a1   :  { %v542_v12 = vpop.permute.xlu0 %541 }
 0x4a2   :  { %v546_v13 = vmul.f32 %v1700_v11, %v542_v12 }
 0x4a3   :  { %v540_v15 = vpop.permute.xlu1 %539 }
 0x4a4   :  { %v545_v16 = vmul.f32 %v1702_v14, %v540_v15  ;;  %551 = vrot.lane.b32.xlu0 %v546_v13, %s1858_s3 }
 0x4a6   :  { %549 = vrot.lane.b32.xlu1 %v545_v16, %s1858_s3 }
 0x516   :  { %v552_v17 = vpop.permute.xlu0 %551 }
 0x517   :  { %v556_v19 = vadd.f32 %v1978_v24, %v552_v17 }
 0x518   :  { %v550_v20 = vpop.permute.xlu1 %549 }
 0x519   :  { %1703 = vtanh.f32 %v556_v19  ;;  %v555_v22 = vadd.f32 %v550_v20, %v1980_v25 }
 0x51b   :  { %1705 = vtanh.f32 %v555_v22 }
 0x523   :  { %v1704_v23 = vpop.eup %1703 }
 0x524   :  { %565 = vrot.lane.b32.xlu0 %v1704_v23, %s1859_s29 }
 0x525   :  { %v1706_v26 = vpop.eup %1705 }
 0x526   :  { %563 = vrot.lane.b32.xlu1 %v1706_v26, %s1859_s29 }
 0x596   :  { %v566_v27 = vpop.permute.xlu0 %565 }
 0x597   :  { %v570_v32 = vmul.f32 %v566_v27, %v560_v28 }
 0x598   :  { %v564_v31 = vpop.permute.xlu1 %563 }
 0x599   :  { %v569_v34 = vmul.f32 %v564_v31, %v559_v29  ;;  %v2018_v37 = vadd.f32 %v575_v35, %v570_v32 }
 0x59b   :  { %v2016_v36 = vadd.f32 %v574_v33, %v569_v34  ;;  %v721_v5 = vrot.slane %v2018_v37, 7 }
 0x59d   :  { %v593_v38 = vrot.slane %v2016_v36, 1  ;;  %v720_v9 = vrot.slane %v2016_v36, 7 }
 0x59f   :  { %v594_v39 = vsel %vm445_vm2, %v2018_v37, %v593_v38 }
 0x5a0   :  { %595 = vrot.lane.b32.xlu1 %v594_v39, %s1859_s29 }
 0x612   :  { %v596_v40 = vpop.permute.xlu1 %595 }
 0x613   :  { %1640 = vmatmul.mubr.msk.f32.vlgmr.msra.gmra.mrb[4].mxu1 %vm50_vm1, %v596_v40 }
 0x614   :  { %1648 = vmatpush3.msra.mxu1 %v1942_v7  ;;  %1649 = vmatprep.mubr.msk.f32.mxu1 %vm1855_vm0, %v1854_v0 }
 0x615   :  { %1657 = vmatprep.subr.mxu1 %v1854_v0 }
 0x6e6   :  { %v665_v41 = vpop.f32.mrb[4].mxu1 }
 0x6e7   :  { %v670_v42 = vrot.slane %v665_v41, 6  ;;  %v671_v43 = vrot.slane %v665_v41, 7  ;;  %v1641_v44 = vpop.f32.mrb[5].mxu1 }
 0x6e9   :  { %v674_v45 = vadd.f32 %v670_v42, %v1980_v25  ;;  %v675_v46 = vadd.f32 %v1978_v24, %v671_v43  ;;  %690 = vrot.lane.b32.xlu1 %v671_v43, %s1857_s2  ;;  %688 = vrot.lane.b32.xlu0 %v670_v42, %s1857_s2 }
 0x6eb   :  { %v1571_v47 = vmul.f32 -1.442695, %v674_v45  ;;  %v1572_v48 = vmul.f32 -1.442695, %v675_v46 }
 0x6ed   :  { %1707 = vpow2.f32 %v1571_v47 }
 0x6ee   :  { %1709 = vpow2.f32 %v1572_v48 }
 0x6f7   :  { %v1708_v49 = vpop.eup %1707 }
 0x6f8   :  { %v1710_v50 = vpop.eup %1709  ;;  %v682_v51 = vadd.f32 1.0, %v1708_v49 }
 0x6f9   :  { %v683_v52 = vadd.f32 1.0, %v1710_v50 }
 0x6fa   :  { %1711 = vrcp.f32 %v682_v51 }
 0x6fb   :  { %1713 = vrcp.f32 %v683_v52 }
 0x704   :  { %v1712_v54 = vpop.eup %1711 }
 0x705   :  { %v1714_v55 = vpop.eup %1713  ;;  %v708_v8 = vsub.f32 1.0, %v1712_v54  ;;  %v724_v13 = vmul.f32 %v1712_v54, %v720_v9 }
 0x706   :  { %v709_v4 = vsub.f32 1.0, %v1714_v55  ;;  %v725_v10 = vmul.f32 %v1714_v55, %v721_v5 }
 0x75b   :  { %v691_v56 = vpop.permute.xlu1 %690  ;;  %v689_v57 = vpop.permute.xlu0 %688 }
 0x75c   :  { %v695_v58 = vmul.f32 %v1714_v55, %v691_v56  ;;  %v694_v60 = vmul.f32 %v1712_v54, %v689_v57 }
 0x75e   :  { %700 = vrot.lane.b32.xlu1 %v695_v58, %s1858_s3  ;;  %698 = vrot.lane.b32.xlu0 %v694_v60, %s1858_s3 }
 0x7d0   :  { %v701_v61 = vpop.permute.xlu1 %700  ;;  %v699_v62 = vpop.permute.xlu0 %698 }
 0x7d1   :  { %v705_v63 = vadd.f32 %v1978_v24, %v701_v61  ;;  %v704_v1 = vadd.f32 %v699_v62, %v1980_v25 }
 0x7d3   :  { %1715 = vtanh.f32 %v705_v63 }
 0x7d4   :  { %1717 = vtanh.f32 %v704_v1 }
 0x7dd   :  { %v1716_v2 = vpop.eup %1715 }
 0x7de   :  { %v1718_v3 = vpop.eup %1717  ;;  %714 = vrot.lane.b32.xlu1 %v1716_v2, %s1859_s29 }
 0x7df   :  { %712 = vrot.lane.b32.xlu0 %v1718_v3, %s1859_s29 }
 0x850   :  { %v715_v6 = vpop.permute.xlu1 %714 }
 0x851   :  { %v719_v11 = vmul.f32 %v715_v6, %v709_v4  ;;  %v713_v12 = vpop.permute.xlu0 %712 }
 0x852   :  { %v718_v14 = vmul.f32 %v713_v12, %v708_v8 }
 0x853   :  { %v2041_v15 = vadd.f32 %v725_v10, %v719_v11 }
 0x854   :  { %v2043_v16 = vadd.f32 %v724_v13, %v718_v14 }
 0x855   :  { %v744_v17 = vrot.slane %v2041_v15, 1  ;;  %v872_v52 = vrot.slane %v2041_v15, 7 }
 0x856   :  { %v743_v19 = vrot.slane %v2043_v16, 2  ;;  %v871_v56 = vrot.slane %v2043_v16, 7 }
 0x858   :  { %v745_v20 = vsel %vm445_vm2, %v744_v17, %v743_v19 }
 0x859   :  { %746 = vrot.lane.b32.xlu0 %v745_v20, %s1859_s29 }
 0x8cb   :  { %v747_v22 = vpop.permute.xlu0 %746 }
 0x8cc   :  { %1645 = vmatmul.mubr.msk.f32.vlgmr.msra.gmra.mrb[6].mxu0 %vm50_vm1, %v747_v22 }
 0x8cd   :  { %1653 = vmatpush3.msra.mxu0 %v1942_v7  ;;  %1654 = vmatprep.mubr.msk.f32.mxu0 %vm1855_vm0, %v1854_v0 }
 0x8ce   :  { %1662 = vmatprep.subr.mxu0 %v1854_v0 }
 0x99f   :  { %v816_v23 = vpop.f32.mrb[6].mxu0 }
 0x9a0   :  { %v821_v26 = vrot.slane %v816_v23, 5  ;;  %v822_v27 = vrot.slane %v816_v23, 6  ;;  %v1646_v28 = vpop.f32.mrb[7].mxu0 }
 0x9a2   :  { %v825_v29 = vadd.f32 %v821_v26, %v1980_v25  ;;  %v826_v30 = vadd.f32 %v1978_v24, %v822_v27  ;;  %841 = vrot.lane.b32.xlu0 %v822_v27, %s1857_s2  ;;  %839 = vrot.lane.b32.xlu1 %v821_v26, %s1857_s2 }
 0x9a4   :  { %v1574_v31 = vmul.f32 -1.442695, %v825_v29  ;;  %v1575_v32 = vmul.f32 -1.442695, %v826_v30 }
 0x9a6   :  { %1719 = vpow2.f32 %v1574_v31 }
 0x9a7   :  { %1721 = vpow2.f32 %v1575_v32 }
 0x9b0   :  { %v1720_v33 = vpop.eup %1719 }
 0x9b1   :  { %v1722_v34 = vpop.eup %1721  ;;  %v833_v35 = vadd.f32 1.0, %v1720_v33 }
 0x9b2   :  { %v834_v38 = vadd.f32 1.0, %v1722_v34 }
 0x9b3   :  { %1723 = vrcp.f32 %v833_v35 }
 0x9b4   :  { %1725 = vrcp.f32 %v834_v38 }
 0x9bd   :  { %v1724_v39 = vpop.eup %1723 }
 0x9be   :  { %v1726_v40 = vpop.eup %1725  ;;  %v859_v55 = vsub.f32 1.0, %v1724_v39  ;;  %v875_v61 = vmul.f32 %v1724_v39, %v871_v56 }
 0x9bf   :  { %v860_v51 = vsub.f32 1.0, %v1726_v40  ;;  %v876_v57 = vmul.f32 %v1726_v40, %v872_v52 }
 0xa14   :  { %v842_v41 = vpop.permute.xlu0 %841  ;;  %v840_v42 = vpop.permute.xlu1 %839 }
 0xa15   :  { %v846_v43 = vmul.f32 %v1726_v40, %v842_v41  ;;  %v845_v44 = vmul.f32 %v1724_v39, %v840_v42 }
 0xa17   :  { %851 = vrot.lane.b32.xlu0 %v846_v43, %s1858_s3  ;;  %849 = vrot.lane.b32.xlu1 %v845_v44, %s1858_s3 }
 0xa89   :  { %v852_v45 = vpop.permute.xlu0 %851  ;;  %v850_v46 = vpop.permute.xlu1 %849 }
 0xa8a   :  { %v856_v47 = vadd.f32 %v1978_v24, %v852_v45  ;;  %v855_v48 = vadd.f32 %v850_v46, %v1980_v25 }
 0xa8c   :  { %1727 = vtanh.f32 %v856_v47 }
 0xa8d   :  { %1729 = vtanh.f32 %v855_v48 }
 0xa96   :  { %v1728_v49 = vpop.eup %1727 }
 0xa97   :  { %v1730_v50 = vpop.eup %1729  ;;  %865 = vrot.lane.b32.xlu0 %v1728_v49, %s1859_s29 }
 0xa98   :  { %863 = vrot.lane.b32.xlu1 %v1730_v50, %s1859_s29 }
 0xb09   :  { %v866_v54 = vpop.permute.xlu0 %865 }
 0xb0a   :  { %v870_v58 = vmul.f32 %v866_v54, %v860_v51  ;;  %v864_v60 = vpop.permute.xlu1 %863 }
 0xb0b   :  { %v869_v62 = vmul.f32 %v864_v60, %v859_v55 }
 0xb0c   :  { %v2066_v63 = vadd.f32 %v876_v57, %v870_v58 }
 0xb0d   :  { %v2068_v1 = vadd.f32 %v875_v61, %v869_v62 }
 0xb0e   :  { %v895_v2 = vrot.slane %v2066_v63, 2  ;;  %v1023_v40 = vrot.slane %v2066_v63, 7 }
 0xb0f   :  { %v894_v3 = vrot.slane %v2068_v1, 3  ;;  %v1022_v43 = vrot.slane %v2068_v1, 7 }
 0xb11   :  { %v896_v4 = vsel %vm445_vm2, %v895_v2, %v894_v3 }
 0xb12   :  { %897 = vrot.lane.b32.xlu1 %v896_v4, %s1859_s29 }
 0xb84   :  { %v898_v5 = vpop.permute.xlu1 %897 }
 0xb85   :  { %1650 = vmatmul.mubr.msk.f32.vlgmr.msra.gmra.mrb[6].mxu1 %vm50_vm1, %v898_v5 }
 0xb86   :  { %1658 = vmatpush3.msra.mxu1 %v1942_v7  ;;  %1659 = vmatprep.mubr.msk.f32.mxu1 %vm1855_vm0, %v1854_v0 }
 0xc58   :  { %v967_v6 = vpop.f32.mrb[6].mxu1 }
 0xc59   :  { %v972_v8 = vrot.slane %v967_v6, 4  ;;  %v973_v9 = vrot.slane %v967_v6, 5  ;;  %v1651_v10 = vpop.f32.mrb[7].mxu1 }
 0xc5b   :  { %v976_v11 = vadd.f32 %v972_v8, %v1980_v25  ;;  %v977_v12 = vadd.f32 %v1978_v24, %v973_v9  ;;  %992 = vrot.lane.b32.xlu1 %v973_v9, %s1857_s2  ;;  %990 = vrot.lane.b32.xlu0 %v972_v8, %s1857_s2 }
 0xc5d   :  { %v1577_v13 = vmul.f32 -1.442695, %v976_v11  ;;  %v1578_v14 = vmul.f32 -1.442695, %v977_v12 }
 0xc5f   :  { %1731 = vpow2.f32 %v1577_v13 }
 0xc60   :  { %1733 = vpow2.f32 %v1578_v14 }
 0xc69   :  { %v1732_v17 = vpop.eup %1731 }
 0xc6a   :  { %v1734_v19 = vpop.eup %1733  ;;  %v984_v20 = vadd.f32 1.0, %v1732_v17 }
 0xc6b   :  { %v985_v22 = vadd.f32 1.0, %v1734_v19 }
 0xc6c   :  { %1735 = vrcp.f32 %v984_v20 }
 0xc6d   :  { %1737 = vrcp.f32 %v985_v22 }
 0xc76   :  { %v1736_v23 = vpop.eup %1735 }
 0xc77   :  { %v1738_v26 = vpop.eup %1737  ;;  %v1010_v42 = vsub.f32 1.0, %v1736_v23  ;;  %v1026_v47 = vmul.f32 %v1736_v23, %v1022_v43 }
 0xc78   :  { %v1011_v39 = vsub.f32 1.0, %v1738_v26  ;;  %v1027_v44 = vmul.f32 %v1738_v26, %v1023_v40 }
 0xccd   :  { %v993_v27 = vpop.permute.xlu1 %992  ;;  %v991_v28 = vpop.permute.xlu0 %990 }
 0xcce   :  { %v997_v29 = vmul.f32 %v1738_v26, %v993_v27  ;;  %v996_v30 = vmul.f32 %v1736_v23, %v991_v28 }
 0xcd0   :  { %1002 = vrot.lane.b32.xlu1 %v997_v29, %s1858_s3  ;;  %1000 = vrot.lane.b32.xlu0 %v996_v30, %s1858_s3 }
 0xd42   :  { %v1003_v31 = vpop.permute.xlu1 %1002  ;;  %v1001_v32 = vpop.permute.xlu0 %1000 }
 0xd43   :  { %v1007_v33 = vadd.f32 %v1978_v24, %v1003_v31  ;;  %v1006_v34 = vadd.f32 %v1001_v32, %v1980_v25 }
 0xd45   :  { %1739 = vtanh.f32 %v1007_v33 }
 0xd46   :  { %1741 = vtanh.f32 %v1006_v34 }
 0xd4f   :  { %v1740_v35 = vpop.eup %1739 }
 0xd50   :  { %v1742_v38 = vpop.eup %1741  ;;  %1016 = vrot.lane.b32.xlu1 %v1740_v35, %s1859_s29 }
 0xd51   :  { %1014 = vrot.lane.b32.xlu0 %v1742_v38, %s1859_s29 }
 0xdc2   :  { %v1017_v41 = vpop.permute.xlu1 %1016 }
 0xdc3   :  { %v1021_v45 = vmul.f32 %v1017_v41, %v1011_v39  ;;  %v1015_v46 = vpop.permute.xlu0 %1014 }
 0xdc4   :  { %v1020_v48 = vmul.f32 %v1015_v46, %v1010_v42 }
 0xdc5   :  { %v2090_v49 = vadd.f32 %v1027_v44, %v1021_v45 }
 0xdc6   :  { %v2092_v50 = vadd.f32 %v1026_v47, %v1020_v48 }
 0xdc7   :  { %v1046_v51 = vrot.slane %v2090_v49, 3  ;;  %v1174_v26 = vrot.slane %v2090_v49, 7 }
 0xdc8   :  { %v1045_v52 = vrot.slane %v2092_v50, 4  ;;  %v1173_v29 = vrot.slane %v2092_v50, 7 }
 0xdca   :  { %v1047_v54 = vsel %vm445_vm2, %v1046_v51, %v1045_v52 }
 0xdcb   :  { %1048 = vrot.lane.b32.xlu0 %v1047_v54, %s1859_s29 }
 0xe3d   :  { %v1049_v55 = vpop.permute.xlu0 %1048 }
 0xe3e   :  { %1655 = vmatmul.mubr.msk.f32.vlgmr.msra.gmra.mrb[8].mxu0 %vm50_vm1, %v1049_v55 }
 0xe3f   :  { %1663 = vmatpush3.msra.mxu0 %v1942_v7  ;;  %1664 = vmatprep.mubr.msk.f32.mxu0 %vm1855_vm0, %v1854_v0 }
 0xf11   :  { %v1118_v56 = vpop.f32.mrb[8].mxu0 }
 0xf12   :  { %v1123_v57 = vrot.slane %v1118_v56, 3  ;;  %v1124_v58 = vrot.slane %v1118_v56, 4  ;;  %v1656_v60 = vpop.f32.mrb[9].mxu0 }
 0xf14   :  { %v1127_v61 = vadd.f32 %v1123_v57, %v1980_v25  ;;  %v1128_v62 = vadd.f32 %v1978_v24, %v1124_v58  ;;  %1143 = vrot.lane.b32.xlu0 %v1124_v58, %s1857_s2  ;;  %1141 = vrot.lane.b32.xlu1 %v1123_v57, %s1857_s2 }
 0xf16   :  { %v1580_v2 = vmul.f32 -1.442695, %v1127_v61  ;;  %v1581_v3 = vmul.f32 -1.442695, %v1128_v62 }
 0xf18   :  { %1743 = vpow2.f32 %v1580_v2 }
 0xf19   :  { %1745 = vpow2.f32 %v1581_v3 }
 0xf22   :  { %v1744_v7 = vpop.eup %1743 }
 0xf23   :  { %v1746_v4 = vpop.eup %1745  ;;  %v1135_v5 = vadd.f32 1.0, %v1744_v7 }
 0xf24   :  { %v1136_v0 = vadd.f32 1.0, %v1746_v4 }
 0xf25   :  { %1747 = vrcp.f32 %v1135_v5 }
 0xf26   :  { %1749 = vrcp.f32 %v1136_v0 }
 0xf2f   :  { %v1748_v6 = vpop.eup %1747 }
 0xf30   :  { %v1750_v8 = vpop.eup %1749  ;;  %v1161_v28 = vsub.f32 1.0, %v1748_v6  ;;  %v1177_v33 = vmul.f32 %v1748_v6, %v1173_v29 }
 0xf31   :  { %v1162_v23 = vsub.f32 1.0, %v1750_v8  ;;  %v1178_v30 = vmul.f32 %v1750_v8, %v1174_v26 }
 0xf86   :  { %v1144_v9 = vpop.permute.xlu0 %1143  ;;  %v1142_v10 = vpop.permute.xlu1 %1141 }
 0xf87   :  { %v1148_v11 = vmul.f32 %v1750_v8, %v1144_v9  ;;  %v1147_v12 = vmul.f32 %v1748_v6, %v1142_v10 }
 0xf89   :  { %1153 = vrot.lane.b32.xlu0 %v1148_v11, %s1858_s3  ;;  %1151 = vrot.lane.b32.xlu1 %v1147_v12, %s1858_s3 }
 0xffb   :  { %v1154_v13 = vpop.permute.xlu0 %1153  ;;  %v1152_v14 = vpop.permute.xlu1 %1151 }
 0xffc   :  { %v1158_v17 = vadd.f32 %v1978_v24, %v1154_v13  ;;  %v1157_v19 = vadd.f32 %v1152_v14, %v1980_v25 }
 0xffe   :  { %1751 = vtanh.f32 %v1158_v17 }
 0xfff   :  { %1753 = vtanh.f32 %v1157_v19 }
0x1008   :  { %v1752_v20 = vpop.eup %1751 }
0x1009   :  { %v1754_v22 = vpop.eup %1753  ;;  %1167 = vrot.lane.b32.xlu0 %v1752_v20, %s1859_s29 }
0x100a   :  { %1165 = vrot.lane.b32.xlu1 %v1754_v22, %s1859_s29 }
0x107b   :  { %v1168_v27 = vpop.permute.xlu0 %1167 }
0x107c   :  { %v1172_v31 = vmul.f32 %v1168_v27, %v1162_v23  ;;  %v1166_v32 = vpop.permute.xlu1 %1165 }
0x107d   :  { %v1171_v34 = vmul.f32 %v1166_v32, %v1161_v28 }
0x107e   :  { %v2114_v35 = vadd.f32 %v1178_v30, %v1172_v31 }
0x107f   :  { %v2116_v38 = vadd.f32 %v1177_v33, %v1171_v34 }
0x1080   :  { %v1197_v39 = vrot.slane %v2114_v35, 4  ;;  %v1325_v10 = vrot.slane %v2114_v35, 7 }
0x1081   :  { %v1196_v40 = vrot.slane %v2116_v38, 5  ;;  %v1324_v13 = vrot.slane %v2116_v38, 7 }
0x1083   :  { %v1198_v41 = vsel %vm445_vm2, %v1197_v39, %v1196_v40 }
0x1084   :  { %1199 = vrot.lane.b32.xlu1 %v1198_v41, %s1859_s29 }
0x10f6   :  { %v1200_v42 = vpop.permute.xlu1 %1199 }
0x10f7   :  { %1660 = vmatmul.mubr.msk.f32.vlgmr.msra.gmra.mrb[8].mxu1 %vm50_vm1, %v1200_v42 }
0x11ca   :  { %v1269_v43 = vpop.f32.mrb[8].mxu1 }
0x11cb   :  { %v1274_v44 = vrot.slane %v1269_v43, 2  ;;  %v1275_v45 = vrot.slane %v1269_v43, 3  ;;  %v1661_v46 = vpop.f32.mrb[9].mxu1 }
0x11cd   :  { %v1278_v47 = vadd.f32 %v1274_v44, %v1980_v25  ;;  %v1279_v48 = vadd.f32 %v1978_v24, %v1275_v45  ;;  %1294 = vrot.lane.b32.xlu1 %v1275_v45, %s1857_s2  ;;  %1292 = vrot.lane.b32.xlu0 %v1274_v44, %s1857_s2 }
0x11cf   :  { %v1583_v51 = vmul.f32 -1.442695, %v1278_v47  ;;  %v1584_v52 = vmul.f32 -1.442695, %v1279_v48 }
0x11d1   :  { %1755 = vpow2.f32 %v1583_v51 }
0x11d2   :  { %1757 = vpow2.f32 %v1584_v52 }
0x11db   :  { %v1756_v54 = vpop.eup %1755 }
0x11dc   :  { %v1758_v55 = vpop.eup %1757  ;;  %v1286_v56 = vadd.f32 1.0, %v1756_v54 }
0x11dd   :  { %v1287_v57 = vadd.f32 1.0, %v1758_v55 }
0x11de   :  { %1759 = vrcp.f32 %v1286_v56 }
0x11df   :  { %1761 = vrcp.f32 %v1287_v57 }
0x11e8   :  { %v1760_v58 = vpop.eup %1759 }
0x11e9   :  { %v1762_v60 = vpop.eup %1761  ;;  %v1312_v12 = vsub.f32 1.0, %v1760_v58  ;;  %v1328_v20 = vmul.f32 %v1760_v58, %v1324_v13 }
0x11ea   :  { %v1313_v9 = vsub.f32 1.0, %v1762_v60  ;;  %v1329_v14 = vmul.f32 %v1762_v60, %v1325_v10 }
0x123f   :  { %v1295_v61 = vpop.permute.xlu1 %1294  ;;  %v1293_v62 = vpop.permute.xlu0 %1292 }
0x1240   :  { %v1299_v2 = vmul.f32 %v1762_v60, %v1295_v61  ;;  %v1298_v3 = vmul.f32 %v1760_v58, %v1293_v62 }
0x1242   :  { %1304 = vrot.lane.b32.xlu1 %v1299_v2, %s1858_s3  ;;  %1302 = vrot.lane.b32.xlu0 %v1298_v3, %s1858_s3  ;;  %v430_v2 = vmul.f32 %v1992_v53, %v1968_v21  ;;  %v429_v3 = vmul.f32 %v1995_v59, %v1964_v18  ;;  %v729_v53 = vmul.f32 %v2041_v15, %v1968_v21 }
0x1243   :  { %v728_v59 = vmul.f32 %v2043_v16, %v1964_v18  ;;  %v1031_v15 = vmul.f32 %v2090_v49, %v1968_v21  ;;  %v1030_v16 = vmul.f32 %v2092_v50, %v1964_v18 }
0x12b4   :  { %v1305_v7 = vpop.permute.xlu1 %1304  ;;  %v1303_v4 = vpop.permute.xlu0 %1302 }
0x12b5   :  { %v1309_v5 = vadd.f32 %v1978_v24, %v1305_v7  ;;  %v1308_v0 = vadd.f32 %v1303_v4, %v1980_v25 }
0x12b7   :  { %1763 = vtanh.f32 %v1309_v5 }
0x12b8   :  { %1765 = vtanh.f32 %v1308_v0 }
0x12c1   :  { %v1764_v6 = vpop.eup %1763 }
0x12c2   :  { %v1766_v8 = vpop.eup %1765  ;;  %1318 = vrot.lane.b32.xlu1 %v1764_v6, %s1859_s29 }
0x12c3   :  { %1316 = vrot.lane.b32.xlu0 %v1766_v8, %s1859_s29 }
0x1334   :  { %v1319_v11 = vpop.permute.xlu1 %1318 }
0x1335   :  { %v1323_v17 = vmul.f32 %v1319_v11, %v1313_v9  ;;  %v1317_v19 = vpop.permute.xlu0 %1316 }
0x1336   :  { %v1322_v22 = vmul.f32 %v1317_v19, %v1312_v12 }
0x1337   :  { %v2135_v23 = vadd.f32 %v1329_v14, %v1323_v17 }
0x1338   :  { %v2137_v26 = vadd.f32 %v1328_v20, %v1322_v22 }
0x1339   :  { %v1348_v27 = vrot.slane %v2135_v23, 5  ;;  %v1333_v49 = vmul.f32 %v2135_v23, %v1968_v21 }
0x133a   :  { %v1347_v28 = vrot.slane %v2137_v26, 6  ;;  %v1332_v50 = vmul.f32 %v2137_v26, %v1964_v18 }
0x133c   :  { %v1349_v29 = vsel %vm445_vm2, %v1348_v27, %v1347_v28 }
0x133d   :  { %1350 = vrot.lane.b32.xlu0 %v1349_v29, %s1859_s29 }
0x13af   :  { %v1351_v30 = vpop.permute.xlu0 %1350 }
0x13b0   :  { %1665 = vmatmul.mubr.msk.f32.vlgmr.msra.gmra.mrb[10].mxu0 %vm50_vm1, %v1351_v30 }
0x1483   :  { %v1420_v31 = vpop.f32.mrb[10].mxu0 }
0x1484   :  { %v1425_v32 = vrot.slane %v1420_v31, 1  ;;  %v1426_v33 = vrot.slane %v1420_v31, 2  ;;  %v1666_v34 = vpop.f32.mrb[11].mxu0 }
0x1486   :  { %v1429_v39 = vadd.f32 %v1425_v32, %v1980_v25  ;;  %v1430_v40 = vadd.f32 %v1978_v24, %v1426_v33  ;;  %1445 = vrot.lane.b32.xlu0 %v1426_v33, %s1857_s2  ;;  %1443 = vrot.lane.b32.xlu1 %v1425_v32, %s1857_s2 }
0x1488   :  { %v1586_v41 = vmul.f32 -1.442695, %v1429_v39  ;;  %v1587_v42 = vmul.f32 -1.442695, %v1430_v40  ;;  %v1588_v39 = vld [vmem:[%s2241_s6] ss:$0 sm:$0xff] }
0x148a   :  { %1767 = vpow2.f32 %v1586_v41 }
0x148b   :  { %1769 = vpow2.f32 %v1587_v42 }
0x1494   :  { %v1768_v43 = vpop.eup %1767 }
0x1495   :  { %v1770_v44 = vpop.eup %1769  ;;  %v1437_v45 = vadd.f32 1.0, %v1768_v43 }
0x1496   :  { %v1438_v46 = vadd.f32 1.0, %v1770_v44 }
0x1497   :  { %1771 = vrcp.f32 %v1437_v45 }
0x1498   :  { %1773 = vrcp.f32 %v1438_v46 }
0x14a1   :  { %v1772_v47 = vpop.eup %1771 }
0x14a2   :  { %v1774_v48 = vpop.eup %1773  ;;  %v1463_v5 = vsub.f32 1.0, %v1772_v47 }
0x14a3   :  { %v1464_v7 = vsub.f32 1.0, %v1774_v48 }
0x14f8   :  { %v1446_v51 = vpop.permute.xlu0 %1445  ;;  %v1444_v52 = vpop.permute.xlu1 %1443 }
0x14f9   :  { %v1450_v54 = vmul.f32 %v1774_v48, %v1446_v51  ;;  %v1449_v55 = vmul.f32 %v1772_v47, %v1444_v52 }
0x14fb   :  { %1455 = vrot.lane.b32.xlu0 %v1450_v54, %s1858_s3  ;;  %1453 = vrot.lane.b32.xlu1 %v1449_v55, %s1858_s3 }
0x156d   :  { %v1456_v56 = vpop.permute.xlu0 %1455  ;;  %v1454_v57 = vpop.permute.xlu1 %1453 }
0x156e   :  { %v1460_v58 = vadd.f32 %v1978_v24, %v1456_v56  ;;  %v1459_v60 = vadd.f32 %v1454_v57, %v1980_v25  ;;  %v579_v24 = vmul.f32 %v2018_v37, %v1968_v21  ;;  %v578_v25 = vmul.f32 %v2016_v36, %v1964_v18 }
0x156f   :  { %v880_v37 = vmul.f32 %v2066_v63, %v1968_v21  ;;  %v879_v36 = vmul.f32 %v2068_v1, %v1964_v18  ;;  %v1182_v63 = vmul.f32 %v2114_v35, %v1968_v21  ;;  %v1181_v1 = vmul.f32 %v2116_v38, %v1964_v18 }
0x1570   :  { %1775 = vtanh.f32 %v1460_v58  ;;  %v1476_v35 = vrot.slane %v2135_v23, 7  ;;  %v1475_v38 = vrot.slane %v2137_v26, 7 }
0x1571   :  { %1777 = vtanh.f32 %v1459_v60 }
0x1572   :  { %v1480_v0 = vmul.f32 %v1774_v48, %v1476_v35  ;;  %v1479_v9 = vmul.f32 %v1772_v47, %v1475_v38 }
0x157a   :  { %v1776_v61 = vpop.eup %1775 }
0x157b   :  { %v1778_v62 = vpop.eup %1777  ;;  %1469 = vrot.lane.b32.xlu0 %v1776_v61, %s1859_s29 }
0x157c   :  { %1467 = vrot.lane.b32.xlu1 %v1778_v62, %s1859_s29 }
0x157f   :  { %435 = vrot.lane.b32.xlu0 %v430_v2, %s1859_s29 }
0x1580   :  { %433 = vrot.lane.b32.xlu1 %v429_v3, %s1859_s29 }
0x1583   :  { %584 = vrot.lane.b32.xlu0 %v579_v24, %s1859_s29 }
0x1584   :  { %582 = vrot.lane.b32.xlu1 %v578_v25, %s1859_s29 }
0x1587   :  { %734 = vrot.lane.b32.xlu0 %v729_v53, %s1859_s29 }
0x1588   :  { %732 = vrot.lane.b32.xlu1 %v728_v59, %s1859_s29 }
0x158b   :  { %885 = vrot.lane.b32.xlu0 %v880_v37, %s1859_s29 }
0x158c   :  { %883 = vrot.lane.b32.xlu1 %v879_v36, %s1859_s29 }
0x158f   :  { %1036 = vrot.lane.b32.xlu0 %v1031_v15, %s1859_s29 }
0x1590   :  { %1034 = vrot.lane.b32.xlu1 %v1030_v16, %s1859_s29 }
0x1593   :  { %1187 = vrot.lane.b32.xlu0 %v1182_v63, %s1859_s29 }
0x1594   :  { %1185 = vrot.lane.b32.xlu1 %v1181_v1, %s1859_s29 }
0x1597   :  { %1338 = vrot.lane.b32.xlu0 %v1333_v49, %s1859_s29 }
0x1598   :  { %1336 = vrot.lane.b32.xlu1 %v1332_v50, %s1859_s29 }
0x15ed   :  { %v1470_v4 = vpop.permute.xlu0 %1469 }
0x15ee   :  { %v1474_v6 = vmul.f32 %v1470_v4, %v1464_v7  ;;  %v1468_v8 = vpop.permute.xlu1 %1467 }
0x15ef   :  { %v1473_v10 = vmul.f32 %v1468_v8, %v1463_v5 }
0x15f0   :  { %v1482_v11 = vadd.f32 %v1480_v0, %v1474_v6 }
0x15f1   :  { %v1481_v12 = vadd.f32 %v1479_v9, %v1473_v10  ;;  %v436_v13 = vpop.permute.xlu0 %435 }
0x15f2   :  { %441 = vst.msk [vmem:[#allocation5 + $0x8] sm:$0x1] %vm439_vm3, %v436_v13  ;;  %v434_v14 = vpop.permute.xlu1 %433  ;;  %v1484_v17 = vmul.f32 %v1482_v11, %v1968_v21 }
0x15f3   :  { %440 = vst.msk [vmem:[#allocation5] sm:$0x1] %vm439_vm3, %v434_v14  ;;  %v1483_v19 = vmul.f32 %v1481_v12, %v1964_v18 }
0x15f4   :  { %1489 = vrot.lane.b32.xlu0 %v1484_v17, %s1859_s29 }
0x15f5   :  { %1487 = vrot.lane.b32.xlu1 %v1483_v19, %s1859_s29  ;;  %v585_v20 = vpop.permute.xlu0 %584 }
0x15f6   :  { %590 = vst.msk [vmem:[#allocation5 + $0x8] sm:$0x2] %vm588_vm4, %v585_v20  ;;  %v583_v22 = vpop.permute.xlu1 %582 }
0x15f7   :  { %589 = vst.msk [vmem:[#allocation5] sm:$0x2] %vm588_vm4, %v583_v22 }
0x15f9   :  { %v735_v23 = vpop.permute.xlu0 %734 }
0x15fa   :  { %740 = vst.msk [vmem:[#allocation5 + $0x8] sm:$0x4] %vm738_vm5, %v735_v23  ;;  %v733_v26 = vpop.permute.xlu1 %732 }
0x15fb   :  { %739 = vst.msk [vmem:[#allocation5] sm:$0x4] %vm738_vm5, %v733_v26 }
0x15fd   :  { %v886_v27 = vpop.permute.xlu0 %885 }
0x15fe   :  { %891 = vst.msk [vmem:[#allocation5 + $0x8] sm:$0x8] %vm889_vm6, %v886_v27  ;;  %v884_v21 = vpop.permute.xlu1 %883 }
0x15ff   :  { %890 = vst.msk [vmem:[#allocation5] sm:$0x8] %vm889_vm6, %v884_v21 }
0x1601   :  { %v1037_v18 = vpop.permute.xlu0 %1036 }
0x1602   :  { %1042 = vst.msk [vmem:[#allocation5 + $0x8] sm:$0x10] %vm1040_vm7, %v1037_v18  ;;  %v1035_v28 = vpop.permute.xlu1 %1034 }
0x1603   :  { %1041 = vst.msk [vmem:[#allocation5] sm:$0x10] %vm1040_vm7, %v1035_v28 }
0x1605   :  { %v1188_v29 = vpop.permute.xlu0 %1187 }
0x1606   :  { %1193 = vst.msk [vmem:[#allocation5 + $0x8] sm:$0x20] %vm1191_vm8, %v1188_v29  ;;  %v1186_v30 = vpop.permute.xlu1 %1185 }
0x1607   :  { %1192 = vst.msk [vmem:[#allocation5] sm:$0x20] %vm1191_vm8, %v1186_v30 }
0x1609   :  { %v1339_v31 = vpop.permute.xlu0 %1338 }
0x160a   :  { %1344 = vst.msk [vmem:[#allocation5 + $0x8] sm:$0x40] %vm1342_vm9, %v1339_v31  ;;  %v1337_v32 = vpop.permute.xlu1 %1336 }
0x160b   :  { %1343 = vst.msk [vmem:[#allocation5] sm:$0x40] %vm1342_vm9, %v1337_v32 }
0x1666   :  { %v1490_v33 = vpop.permute.xlu0 %1489 }
0x1667   :  { %1495 = vst.msk [vmem:[#allocation5 + $0x8] sm:$0x80] %vm1493_vm10, %v1490_v33  ;;  %v1488_v34 = vpop.permute.xlu1 %1487 }
0x1668   :  { %1494 = vst.msk [vmem:[#allocation5] sm:$0x80] %vm1493_vm10, %v1488_v34 }
0x166e   :  { %v1497_v40 = vld [vmem:[#allocation5 + $0x8] sm:$0xff] }
0x166f   :  { %v1506_v41 = vmul.f32 %v1588_v39, %v1497_v40  ;;  %v1496_v42 = vld [vmem:[#allocation5] sm:$0xff] }
0x1670   :  { %v1505_v43 = vmul.f32 %v1588_v39, %v1496_v42 }
0x1671   :  { %v1510_v44 = vsel %vm50_vm1, %v1506_v41, 0.0 }
0x1672   :  { %1511 = vadd.xlane.f32.xlu0 %v1510_v44  ;;  %v1507_v45 = vsel %vm50_vm1, %v1505_v43, 0.0 }
0x1673   :  { %1508 = vadd.xlane.f32.xlu1 %v1507_v45 }
0x1674   :  { %1812 = shalt.err (!%p1809_p12)
}
0x1675   :  { %s1813_s14 = scalar_lea.hbm %s2242_s7, 256 }
0x1676   :  { %p1814_p13 = scmp.ne.s32.totalorder %s2242_s7, %s1813_s14  ;;  %p1817_p0 = scmp.lt.u32.totalorder %s1813_s14, %s2242_s7 }
0x1678   :  { %p1819_p1 = pnand %p1817_p0, %p1814_p13 }
0x167a   :  { %1822 = shalt.err (!%p1819_p1)
}
0x167b   :  { %1540 = dma.vmem_to_hbm [thread:$0]  %s1535_s11, 256, %s2242_s7, [#allocation4], %s1852_s15, %s1852_s15, %s1853_s16   ;;  %v1515_v46 = vlaneseq  ;;  %vm1527_vm11 = vcmask 58368  }
0x167c   :  { %s1861_s22 = smov [#allocation6]  }
0x167d   :  { %v1516_v47 = vand.u32 127, %v1515_v46  ;;  %v1518_v48 = vshrl.u32 %v1515_v46, 7  ;;  %s1547_s23 = sshll.u32 %s1861_s22, 4  ;;  %s1548_s23 = int_to_ptr.vmem [resolvable:$true] %s1547_s23 }
0x167e   :  { %s1823_s24 = scalar_lea.vmem %s1548_s23, 32  ;;  %p1828_p3 = scmp.lt.s32.totalorder %s1548_s23, %s1548_s23 }
0x167f   :  { %v1519_v51 = vsub.s32 %v1516_v47, %v1518_v48  ;;  %p1824_p2 = scmp.ne.s32.totalorder %s1548_s23, %s1823_s24  ;;  %p1829_p4 = scmp.lt.s32.totalorder %s1823_s24, %s1823_s24 }
0x1681   :  { %p1830_p5 = por %p1829_p4, %p1828_p3 }
0x1683   :  { %p1831_p6 = pnand %p1830_p5, %p1824_p2 }
0x16ff   :  { %v1512_v52 = vpop.xlane.xlu0 %1511 }
0x1700   :  { %v1524_v54 = vrot.slane %v1512_v52, %v1519_v51  ;;  %v1509_v55 = vpop.xlane.xlu1 %1508 }
0x1701   :  { %v1520_v56 = vrot.slane %v1509_v55, %v1519_v51 }
0x1703   :  { %v1525_v57 = vsel %vm445_vm2, %v1524_v54, %v1520_v56 }
0x1704   :  { %1528 = vst.msk [vmem:[#allocation6] sm:$0x3] %vm1527_vm11, %v1525_v57 }
0x1705   :  { %1834 = shalt.err (!%p1831_p6)
}
0x1706   :  { %s1835_s16 = scalar_lea.hbm %s2243_s8, 32 }
0x1707   :  { %p1836_p7 = scmp.ne.s32.totalorder %s2243_s8, %s1835_s16  ;;  %p1839_p8 = scmp.lt.u32.totalorder %s1835_s16, %s2243_s8 }
0x1709   :  { %p1841_p9 = pnand %p1839_p8, %p1836_p7 }
0x170b   :  { %1844 = shalt.err (!%p1841_p9)
}
0x170c   :  { %1550 = dma.vmem_to_hbm [thread:$0]  %s1548_s23, 32, %s2243_s8, [#allocation7]  }
0x170d   :  { %1847 = dma.done.wait [#allocation4], 256  }
0x170e   :  { %1848 = vsyncadd [#allocation4], 4294967040 }
0x170f   :  { %1849 = dma.done.wait [#allocation7], 32  }
0x1710   :  { %1850 = vsyncadd [#allocation7], 4294967264 }
0x1711   :  { %1557 = vsyncpa [#allocation3], 1 }
0x1712   :  { %1558 = vsyncpa [#allocation4], 1 }
0x1713   :  { %1559 = vsyncpa [#allocation7], 1 }

</bundles_post_ra>
